<compile_context>
chip_gen: v7x
topology: tpu7x:2x2x1
jax: 0.10.0
libtpu: 0.0.40
codegen_flags: <defaults>
</compile_context>

<pallas_src>
import functools

import jax
import jax.numpy as jnp
import numpy as np
from jax import lax
from jax.experimental import pallas as pl
from jax.experimental.pallas import tpu as pltpu


# -----------------------------------------------------------------------------
# Fused kernel: conv1+pool1+relu1 -> conv2+pool2+relu2 -> flatten -> fc1+relu -> fc2
# Row convention for all activation slabs: row index = spatial_row * tb + batch.
# -----------------------------------------------------------------------------
def _convnet_kernel(x_ref, t1_ref, b1_ref, t2_ref, b2_ref,
                    f1_ref, fb1_ref, f2_ref, fb2_ref, o_ref, *, tb):
    f32, bf16 = jnp.float32, jnp.bfloat16

    # ---- conv1 (5x5, 1->10): ONE folded-K MXU matmul ------------------------
    xt = x_ref[...]                                             # (28, tb, 28): (row, b, col)
    # Folded-K LHS: lane block di*28..di*28+27 holds image row (i + di).
    lhs1 = jnp.concatenate([xt[di:di + 24] for di in range(5)], axis=-1)   # (24, tb, 140)
    c1 = jnp.dot(lhs1.reshape(24 * tb, 140).astype(bf16), t1_ref[...],
                 preferred_element_type=f32)                    # (24*tb, 240), rows (i, b)
    # 2x2 max-pool over W: even/odd output columns live in separate lane halves.
    cw1 = jnp.maximum(c1[:, :120], c1[:, 120:])                 # (24*tb, 120)
    # 2x2 max-pool over H: rows i=2h and i=2h+1 are adjacent tb-row blocks.
    c1p = cw1.reshape(12, 2 * tb, 120)                          # free (tb % 8 == 0)
    p1 = jnp.maximum(jnp.maximum(c1p[:, :tb], c1p[:, tb:]) + b1_ref[...], 0.0)  # (12, tb, 120)

    # ---- conv2 (5x5, 10->20): ONE folded-K MXU matmul ------------------------
    lhs2 = jnp.concatenate([p1[di:di + 8] for di in range(5)], axis=-1)    # (8, tb, 600)
    c2 = jnp.dot(lhs2.reshape(8 * tb, 600).astype(bf16), t2_ref[...],
                 preferred_element_type=f32)                    # (8*tb, 160), rows (r, b)
    cw2 = jnp.maximum(c2[:, :80], c2[:, 80:])                   # pool over W -> (8*tb, 80)
    c2p = cw2.reshape(4, 2 * tb, 80)
    p2 = jnp.maximum(jnp.maximum(c2p[:, :tb], c2p[:, tb:]) + b2_ref[...], 0.0)  # (4, tb, 80)

    # ---- flatten (NCHW permutation folded into F1), fc1+ReLU, fc2 ------------
    flat = jnp.concatenate([p2[h] for h in range(4)], axis=-1)  # (tb, 320)
    h1 = jnp.maximum(
        jnp.dot(flat.astype(bf16), f1_ref[...], preferred_element_type=f32)
        + fb1_ref[...], 0.0)                                    # (tb, 50)
    logits = jnp.dot(h1.astype(bf16), f2_ref[...],
                     preferred_element_type=f32) + fb2_ref[...] # (tb, 128)
    o_ref[...] = logits                                         # unmasked lane-dense store


# -----------------------------------------------------------------------------
# One-time weight re-layout (outside the jitted forward).
# -----------------------------------------------------------------------------
def prepare_params(params):
    w1 = np.asarray(params["conv1_w"], np.float32)    # (10, 1, 5, 5)
    b1 = np.asarray(params["conv1_b"], np.float32)    # (10,)
    w2 = np.asarray(params["conv2_w"], np.float32)    # (20, 10, 5, 5)
    b2 = np.asarray(params["conv2_b"], np.float32)    # (20,)
    fc1w = np.asarray(params["fc1_w"], np.float32)    # (50, 320)
    fc1b = np.asarray(params["fc1_b"], np.float32)    # (50,)
    fc2w = np.asarray(params["fc2_w"], np.float32)    # (10, 50)
    fc2b = np.asarray(params["fc2_b"], np.float32)    # (10,)

    # conv1 folded row-Toeplitz: K = (di, input col a) = 5*28 = 140,
    # N = (parity, pooled out col q, out ch o) = 2*12*10 = 240; output col j = 2q+par.
    T1 = np.zeros((140, 240), np.float32)
    for par in range(2):
        for di in range(5):
            for dj in range(5):
                for q in range(12):
                    row = di * 28 + 2 * q + par + dj
                    col = par * 120 + q * 10
                    T1[row, col:col + 10] = w1[:, 0, di, dj]
    b1_row = np.tile(b1, 12).reshape(1, 120)                    # lane = q*10 + o

    # conv2 folded row-Toeplitz: K = (di, pooled col q, in ch c) = 5*12*10 = 600,
    # N = (parity, pooled out col u, out ch o) = 2*4*20 = 160; output col s = 2u+par.
    T2 = np.zeros((600, 160), np.float32)
    for par in range(2):
        for di in range(5):
            for dj in range(5):
                for u in range(4):
                    q = 2 * u + par + dj                        # p1 column needed
                    for c in range(10):
                        row = di * 120 + q * 10 + c
                        col = par * 80 + u * 20
                        T2[row, col:col + 20] = w2[:, c, di, dj]
    b2_row = np.tile(b2, 4).reshape(1, 80)                      # lane = u*20 + o

    # fc1 with the PyTorch NCHW-flatten permutation folded in.
    # Kernel feature order: h*80 + u*20 + o ; torch order: o*16 + h*4 + u.
    F1 = np.zeros((320, 50), np.float32)
    for h in range(4):
        for u in range(4):
            for o in range(20):
                F1[h * 80 + u * 20 + o, :] = fc1w[:, o * 16 + h * 4 + u]
    fb1 = fc1b.reshape(1, 50)

    # fc2 zero-padded to 128 output lanes for an unmasked lane-dense store.
    F2 = np.zeros((50, 128), np.float32)
    F2[:, :10] = fc2w.T
    fb2 = np.zeros((1, 128), np.float32)
    fb2[0, :10] = fc2b

    return dict(
        T1=jnp.asarray(T1, jnp.bfloat16), b1=jnp.asarray(b1_row, jnp.float32),
        T2=jnp.asarray(T2, jnp.bfloat16), b2=jnp.asarray(b2_row, jnp.float32),
        F1=jnp.asarray(F1, jnp.bfloat16), fb1=jnp.asarray(fb1, jnp.float32),
        F2=jnp.asarray(F2, jnp.bfloat16), fb2=jnp.asarray(fb2, jnp.float32),
    )


# -----------------------------------------------------------------------------
# Forward pass wrapper (single pallas_call, grid over batch tiles).
# -----------------------------------------------------------------------------
def convnet_forward(x_nchw, prepped):
    """x_nchw: (B, 1, 28, 28) -> (B, 10) logits (eval-mode dropout)."""
    B = x_nchw.shape[0]
    assert x_nchw.shape[1:] == (1, 28, 28)
    x = x_nchw.astype(jnp.float32).reshape(B, 28, 28)

    # Batch tile: <=64, multiple of 8, and >=2 grid steps once B >= 16 so the
    # "parallel" grid axis can shard across v7x's two TensorCores.
    tb = min(64, max(8, (B // 16) * 8))
    b_pad = pl.cdiv(B, tb) * tb
    if b_pad != B:
        x = jnp.pad(x, ((0, b_pad - B), (0, 0), (0, 0)))
    # One-time cheap relayout of the (tiny) input: (row, batch, col) so that all
    # in-kernel pooling / band slices are contiguous tile-aligned blocks.
    x_t = jnp.transpose(x, (1, 0, 2))                           # (28, b_pad, 28)

    weight_ops = [prepped["T1"], prepped["b1"], prepped["T2"], prepped["b2"],
                  prepped["F1"], prepped["fb1"], prepped["F2"], prepped["fb2"]]

    # Advisory cost estimate (matmul MACs * 2).
    flops_per_img = 2 * (24 * 140 * 240 + 8 * 600 * 160 + 320 * 50 + 50 * 128)
    weight_bytes = sum(int(a.size) * a.dtype.itemsize for a in weight_ops)
    cost = pl.CostEstimate(
        flops=flops_per_img * b_pad,
        transcendentals=0,
        bytes_accessed=int(x_t.size) * 4 + b_pad * 128 * 4 + weight_bytes)

    def _const_spec(a):
        zeros = (0,) * a.ndim        # same block every step -> DMA'd once, stays resident
        return pl.BlockSpec(a.shape, lambda i, zeros=zeros: zeros)

    out = pl.pallas_call(
        functools.partial(_convnet_kernel, tb=tb),
        out_shape=jax.ShapeDtypeStruct((b_pad, 128), jnp.float32),
        grid=(b_pad // tb,),
        in_specs=[pl.BlockSpec((28, tb, 28), lambda i: (0, i, 0))]
                 + [_const_spec(a) for a in weight_ops],
        out_specs=pl.BlockSpec((tb, 128), lambda i: (i, 0)),
        compiler_params=pltpu.CompilerParams(
            dimension_semantics=("parallel",),
            vmem_limit_bytes=32 * 1024 * 1024),
        cost_estimate=cost,
    )(x_t, *weight_ops)
    return out[:B, :10]


# -----------------------------------------------------------------------------
# Pure-JAX reference (for correctness verification) and param init.
# -----------------------------------------------------------------------------
def convnet_reference(x_nchw, params):
    x = x_nchw.astype(jnp.float32)
    y = lax.conv_general_dilated(x, params["conv1_w"], (1, 1), "VALID",
                                 dimension_numbers=("NCHW", "OIHW", "NCHW"))
    y = y + params["conv1_b"][None, :, None, None]
    y = lax.reduce_window(y, -jnp.inf, lax.max, (1, 1, 2, 2), (1, 1, 2, 2), "VALID")
    y = jnp.maximum(y, 0.0)
    y = lax.conv_general_dilated(y, params["conv2_w"], (1, 1), "VALID",
                                 dimension_numbers=("NCHW", "OIHW", "NCHW"))
    y = y + params["conv2_b"][None, :, None, None]
    y = lax.reduce_window(y, -jnp.inf, lax.max, (1, 1, 2, 2), (1, 1, 2, 2), "VALID")
    y = jnp.maximum(y, 0.0)
    y = y.reshape(x.shape[0], -1)                               # NCHW flatten -> (B, 320)
    y = jnp.maximum(y @ params["fc1_w"].T + params["fc1_b"], 0.0)
    return y @ params["fc2_w"].T + params["fc2_b"]


def init_params(key):
    ks = jax.random.split(key, 8)
    s = 0.1
    return {
        "conv1_w": s * jax.random.normal(ks[0], (10, 1, 5, 5), jnp.float32),
        "conv1_b": s * jax.random.normal(ks[1], (10,), jnp.float32),
        "conv2_w": s * jax.random.normal(ks[2], (20, 10, 5, 5), jnp.float32),
        "conv2_b": s * jax.random.normal(ks[3], (20,), jnp.float32),
        "fc1_w": s * jax.random.normal(ks[4], (50, 320), jnp.float32),
        "fc1_b": s * jax.random.normal(ks[5], (50,), jnp.float32),
        "fc2_w": s * jax.random.normal(ks[6], (10, 50), jnp.float32),
        "fc2_b": s * jax.random.normal(ks[7], (10,), jnp.float32),
    }


if __name__ == "__main__":
    key = jax.random.PRNGKey(0)
    pkey, xkey, xkey2 = jax.random.split(key, 3)
    params = init_params(pkey)
    prepped = prepare_params(params)          # one-time weight re-layout, outside jit

    fwd = jax.jit(convnet_forward)
    ref_fn = jax.jit(convnet_reference)

    # MNIST-shaped input (28x28 is required so that flatten yields 320 features).
    x = jax.random.normal(xkey, (2, 1, 28, 28), jnp.float32)
    out = jax.block_until_ready(fwd(x, prepped))
    assert out.shape == (2, 10) and out.dtype == jnp.float32
    ref = jax.block_until_ready(ref_fn(x, params))
    # Tolerance sized for bf16 MXU operands (f32 accumulation); logits are O(1) and a
    # layout/index bug would produce O(1) errors, far above this bound.
    np.testing.assert_allclose(np.asarray(out), np.asarray(ref), rtol=5e-2, atol=1e-1)

    # Also exercise a multi-step grid (tb=24, 2 grid steps) for coverage.
    x2 = jax.random.normal(xkey2, (48, 1, 28, 28), jnp.float32)
    out2 = jax.block_until_ready(fwd(x2, prepped))
    ref2 = jax.block_until_ready(ref_fn(x2, params))
    np.testing.assert_allclose(np.asarray(out2), np.asarray(ref2), rtol=5e-2, atol=1e-1)

    print("KERNEL_OK")
</pallas_src>

<mosaic_0001>
module attributes {stable_mosaic.version = 11 : i64} {
  func.func @_convnet_kernel(%arg0: i32, %arg1: memref<28x8x28xf32, #tpu.memory_space<vmem>>, %arg2: memref<140x240xbf16, #tpu.memory_space<vmem>>, %arg3: memref<1x120xf32, #tpu.memory_space<vmem>>, %arg4: memref<600x160xbf16, #tpu.memory_space<vmem>>, %arg5: memref<1x80xf32, #tpu.memory_space<vmem>>, %arg6: memref<320x50xbf16, #tpu.memory_space<vmem>>, %arg7: memref<1x50xf32, #tpu.memory_space<vmem>>, %arg8: memref<50x128xbf16, #tpu.memory_space<vmem>>, %arg9: memref<1x128xf32, #tpu.memory_space<vmem>>, %arg10: memref<8x128xf32, #tpu.memory_space<vmem>>) attributes {dimension_semantics = [#tpu.dimension_semantics<parallel>], iteration_bounds = array<i64: 1>, scalar_prefetch = 0 : i64, scratch_operands = 0 : i64, tpu.core_type = #tpu.core_type<tc>, window_params = [{transform_indices = @transform_0, window_bounds = array<i64: 28, 8, 28>}, {pipeline_mode = #tpu.pipeline_mode<synchronous>, transform_indices = @transform_1, window_bounds = array<i64: 140, 240>}, {pipeline_mode = #tpu.pipeline_mode<synchronous>, transform_indices = @transform_2, window_bounds = array<i64: 1, 120>}, {pipeline_mode = #tpu.pipeline_mode<synchronous>, transform_indices = @transform_3, window_bounds = array<i64: 600, 160>}, {pipeline_mode = #tpu.pipeline_mode<synchronous>, transform_indices = @transform_4, window_bounds = array<i64: 1, 80>}, {pipeline_mode = #tpu.pipeline_mode<synchronous>, transform_indices = @transform_5, window_bounds = array<i64: 320, 50>}, {pipeline_mode = #tpu.pipeline_mode<synchronous>, transform_indices = @transform_6, window_bounds = array<i64: 1, 50>}, {pipeline_mode = #tpu.pipeline_mode<synchronous>, transform_indices = @transform_7, window_bounds = array<i64: 50, 128>}, {pipeline_mode = #tpu.pipeline_mode<synchronous>, transform_indices = @transform_8, window_bounds = array<i64: 1, 128>}, {transform_indices = @transform_9, window_bounds = array<i64: 8, 128>}]} {
    %c0 = arith.constant 0 : index
    %c0_0 = arith.constant 0 : index
    %c0_1 = arith.constant 0 : index
    %0 = vector.load %arg1[%c0, %c0_0, %c0_1] : memref<28x8x28xf32, #tpu.memory_space<vmem>>, vector<28x8x28xf32>
    %1 = vector.extract_strided_slice %0 {offsets = [0, 0, 0], sizes = [24, 8, 28], strides = [1, 1, 1]} : vector<28x8x28xf32> to vector<24x8x28xf32>
    %2 = vector.extract_strided_slice %0 {offsets = [1, 0, 0], sizes = [24, 8, 28], strides = [1, 1, 1]} : vector<28x8x28xf32> to vector<24x8x28xf32>
    %3 = vector.extract_strided_slice %0 {offsets = [2, 0, 0], sizes = [24, 8, 28], strides = [1, 1, 1]} : vector<28x8x28xf32> to vector<24x8x28xf32>
    %4 = vector.extract_strided_slice %0 {offsets = [3, 0, 0], sizes = [24, 8, 28], strides = [1, 1, 1]} : vector<28x8x28xf32> to vector<24x8x28xf32>
    %5 = vector.extract_strided_slice %0 {offsets = [4, 0, 0], sizes = [24, 8, 28], strides = [1, 1, 1]} : vector<28x8x28xf32> to vector<24x8x28xf32>
    %6 = tpu.concatenate %1, %2, %3, %4, %5 in 2 : vector<24x8x28xf32>, vector<24x8x28xf32>, vector<24x8x28xf32>, vector<24x8x28xf32>, vector<24x8x28xf32> -> vector<24x8x140xf32>
    %7 = vector.shape_cast %6 : vector<24x8x140xf32> to vector<192x140xf32>
    %8 = arith.truncf %7 : vector<192x140xf32> to vector<192x140xbf16>
    %c0_2 = arith.constant 0 : index
    %c0_3 = arith.constant 0 : index
    %9 = vector.load %arg2[%c0_2, %c0_3] : memref<140x240xbf16, #tpu.memory_space<vmem>>, vector<140x240xbf16>
    %cst = arith.constant dense<0.000000e+00> : vector<192x240xf32>
    %10 = tpu.matmul %8, %9, %cst {dimension_numbers = #tpu.dot_dimension_numbers<[1], [0], [0], [1], [0, 0, 1, 1], [], []>} : vector<192x140xbf16>, vector<140x240xbf16>, vector<192x240xf32> -> vector<192x240xf32>
    %11 = vector.extract_strided_slice %10 {offsets = [0, 0], sizes = [192, 120], strides = [1, 1]} : vector<192x240xf32> to vector<192x120xf32>
    %12 = vector.extract_strided_slice %10 {offsets = [0, 120], sizes = [192, 120], strides = [1, 1]} : vector<192x240xf32> to vector<192x120xf32>
    %13 = arith.maximumf %11, %12 : vector<192x120xf32>
    %14 = vector.shape_cast %13 : vector<192x120xf32> to vector<12x16x120xf32>
    %15 = vector.extract_strided_slice %14 {offsets = [0, 0, 0], sizes = [12, 8, 120], strides = [1, 1, 1]} : vector<12x16x120xf32> to vector<12x8x120xf32>
    %16 = vector.extract_strided_slice %14 {offsets = [0, 8, 0], sizes = [12, 8, 120], strides = [1, 1, 1]} : vector<12x16x120xf32> to vector<12x8x120xf32>
    %17 = arith.maximumf %15, %16 : vector<12x8x120xf32>
    %c0_4 = arith.constant 0 : index
    %c0_5 = arith.constant 0 : index
    %18 = vector.load %arg3[%c0_4, %c0_5] : memref<1x120xf32, #tpu.memory_space<vmem>>, vector<1x120xf32>
    %19 = vector.shape_cast %18 : vector<1x120xf32> to vector<1x1x120xf32>
    %20 = vector.broadcast %19 : vector<1x1x120xf32> to vector<12x8x120xf32>
    %21 = arith.addf %17, %20 : vector<12x8x120xf32>
    %cst_6 = arith.constant 0.000000e+00 : f32
    %22 = vector.broadcast %cst_6 : f32 to vector<12x8x120xf32>
    %23 = arith.maximumf %21, %22 : vector<12x8x120xf32>
    %24 = vector.extract_strided_slice %23 {offsets = [0, 0, 0], sizes = [8, 8, 120], strides = [1, 1, 1]} : vector<12x8x120xf32> to vector<8x8x120xf32>
    %25 = vector.extract_strided_slice %23 {offsets = [1, 0, 0], sizes = [8, 8, 120], strides = [1, 1, 1]} : vector<12x8x120xf32> to vector<8x8x120xf32>
    %26 = vector.extract_strided_slice %23 {offsets = [2, 0, 0], sizes = [8, 8, 120], strides = [1, 1, 1]} : vector<12x8x120xf32> to vector<8x8x120xf32>
    %27 = vector.extract_strided_slice %23 {offsets = [3, 0, 0], sizes = [8, 8, 120], strides = [1, 1, 1]} : vector<12x8x120xf32> to vector<8x8x120xf32>
    %28 = vector.extract_strided_slice %23 {offsets = [4, 0, 0], sizes = [8, 8, 120], strides = [1, 1, 1]} : vector<12x8x120xf32> to vector<8x8x120xf32>
    %29 = tpu.concatenate %24, %25, %26, %27, %28 in 2 : vector<8x8x120xf32>, vector<8x8x120xf32>, vector<8x8x120xf32>, vector<8x8x120xf32>, vector<8x8x120xf32> -> vector<8x8x600xf32>
    %30 = vector.shape_cast %29 : vector<8x8x600xf32> to vector<64x600xf32>
    %31 = arith.truncf %30 : vector<64x600xf32> to vector<64x600xbf16>
    %c0_7 = arith.constant 0 : index
    %c0_8 = arith.constant 0 : index
    %32 = vector.load %arg4[%c0_7, %c0_8] : memref<600x160xbf16, #tpu.memory_space<vmem>>, vector<600x160xbf16>
    %cst_9 = arith.constant dense<0.000000e+00> : vector<64x160xf32>
    %33 = tpu.matmul %31, %32, %cst_9 {dimension_numbers = #tpu.dot_dimension_numbers<[1], [0], [0], [1], [0, 0, 1, 1], [], []>} : vector<64x600xbf16>, vector<600x160xbf16>, vector<64x160xf32> -> vector<64x160xf32>
    %34 = vector.extract_strided_slice %33 {offsets = [0, 0], sizes = [64, 80], strides = [1, 1]} : vector<64x160xf32> to vector<64x80xf32>
    %35 = vector.extract_strided_slice %33 {offsets = [0, 80], sizes = [64, 80], strides = [1, 1]} : vector<64x160xf32> to vector<64x80xf32>
    %36 = arith.maximumf %34, %35 : vector<64x80xf32>
    %37 = vector.shape_cast %36 : vector<64x80xf32> to vector<4x16x80xf32>
    %38 = vector.extract_strided_slice %37 {offsets = [0, 0, 0], sizes = [4, 8, 80], strides = [1, 1, 1]} : vector<4x16x80xf32> to vector<4x8x80xf32>
    %39 = vector.extract_strided_slice %37 {offsets = [0, 8, 0], sizes = [4, 8, 80], strides = [1, 1, 1]} : vector<4x16x80xf32> to vector<4x8x80xf32>
    %40 = arith.maximumf %38, %39 : vector<4x8x80xf32>
    %c0_10 = arith.constant 0 : index
    %c0_11 = arith.constant 0 : index
    %41 = vector.load %arg5[%c0_10, %c0_11] : memref<1x80xf32, #tpu.memory_space<vmem>>, vector<1x80xf32>
    %42 = vector.shape_cast %41 : vector<1x80xf32> to vector<1x1x80xf32>
    %43 = vector.broadcast %42 : vector<1x1x80xf32> to vector<4x8x80xf32>
    %44 = arith.addf %40, %43 : vector<4x8x80xf32>
    %cst_12 = arith.constant 0.000000e+00 : f32
    %45 = vector.broadcast %cst_12 : f32 to vector<4x8x80xf32>
    %46 = arith.maximumf %44, %45 : vector<4x8x80xf32>
    %47 = vector.extract_strided_slice %46 {offsets = [0, 0, 0], sizes = [1, 8, 80], strides = [1, 1, 1]} : vector<4x8x80xf32> to vector<1x8x80xf32>
    %48 = vector.shape_cast %47 : vector<1x8x80xf32> to vector<8x80xf32>
    %49 = vector.extract_strided_slice %46 {offsets = [1, 0, 0], sizes = [1, 8, 80], strides = [1, 1, 1]} : vector<4x8x80xf32> to vector<1x8x80xf32>
    %50 = vector.shape_cast %49 : vector<1x8x80xf32> to vector<8x80xf32>
    %51 = vector.extract_strided_slice %46 {offsets = [2, 0, 0], sizes = [1, 8, 80], strides = [1, 1, 1]} : vector<4x8x80xf32> to vector<1x8x80xf32>
    %52 = vector.shape_cast %51 : vector<1x8x80xf32> to vector<8x80xf32>
    %53 = vector.extract_strided_slice %46 {offsets = [3, 0, 0], sizes = [1, 8, 80], strides = [1, 1, 1]} : vector<4x8x80xf32> to vector<1x8x80xf32>
    %54 = vector.shape_cast %53 : vector<1x8x80xf32> to vector<8x80xf32>
    %55 = tpu.concatenate %48, %50, %52, %54 in 1 : vector<8x80xf32>, vector<8x80xf32>, vector<8x80xf32>, vector<8x80xf32> -> vector<8x320xf32>
    %56 = arith.truncf %55 : vector<8x320xf32> to vector<8x320xbf16>
    %c0_13 = arith.constant 0 : index
    %c0_14 = arith.constant 0 : index
    %57 = vector.load %arg6[%c0_13, %c0_14] : memref<320x50xbf16, #tpu.memory_space<vmem>>, vector<320x50xbf16>
    %cst_15 = arith.constant dense<0.000000e+00> : vector<8x50xf32>
    %58 = tpu.matmul %56, %57, %cst_15 {dimension_numbers = #tpu.dot_dimension_numbers<[1], [0], [0], [1], [0, 0, 1, 1], [], []>} : vector<8x320xbf16>, vector<320x50xbf16>, vector<8x50xf32> -> vector<8x50xf32>
    %c0_16 = arith.constant 0 : index
    %c0_17 = arith.constant 0 : index
    %59 = vector.load %arg7[%c0_16, %c0_17] : memref<1x50xf32, #tpu.memory_space<vmem>>, vector<1x50xf32>
    %60 = vector.broadcast %59 : vector<1x50xf32> to vector<8x50xf32>
    %61 = arith.addf %58, %60 : vector<8x50xf32>
    %cst_18 = arith.constant 0.000000e+00 : f32
    %62 = vector.broadcast %cst_18 : f32 to vector<8x50xf32>
    %63 = arith.maximumf %61, %62 : vector<8x50xf32>
    %64 = arith.truncf %63 : vector<8x50xf32> to vector<8x50xbf16>
    %c0_19 = arith.constant 0 : index
    %c0_20 = arith.constant 0 : index
    %65 = vector.load %arg8[%c0_19, %c0_20] : memref<50x128xbf16, #tpu.memory_space<vmem>>, vector<50x128xbf16>
    %cst_21 = arith.constant dense<0.000000e+00> : vector<8x128xf32>
    %66 = tpu.matmul %64, %65, %cst_21 {dimension_numbers = #tpu.dot_dimension_numbers<[1], [0], [0], [1], [0, 0, 1, 1], [], []>} : vector<8x50xbf16>, vector<50x128xbf16>, vector<8x128xf32> -> vector<8x128xf32>
    %c0_22 = arith.constant 0 : index
    %c0_23 = arith.constant 0 : index
    %67 = vector.load %arg9[%c0_22, %c0_23] : memref<1x128xf32, #tpu.memory_space<vmem>>, vector<1x128xf32>
    %68 = vector.broadcast %67 : vector<1x128xf32> to vector<8x128xf32>
    %69 = arith.addf %66, %68 : vector<8x128xf32>
    %c0_24 = arith.constant 0 : index
    %c0_25 = arith.constant 0 : index
    %70 = vector.load %arg10[%c0_24, %c0_25] : memref<8x128xf32, #tpu.memory_space<vmem>>, vector<8x128xf32>
    tpu.vector_store %arg10[%c0_24, %c0_25], %69 {strides = array<i32>} : memref<8x128xf32, #tpu.memory_space<vmem>>, vector<8x128xf32>,
    return
  }
  func.func @transform_0(%arg0: i32) -> (i32, i32, i32) {
    %c0_i32 = arith.constant 0 : i32
    %c0_i32_0 = arith.constant 0 : i32
    %c0_i32_1 = arith.constant 0 : i32
    return %c0_i32, %arg0, %c0_i32_0 : i32, i32, i32
  }
  func.func @transform_1(%arg0: i32) -> (i32, i32) {
    %c0_i32 = arith.constant 0 : i32
    %c0_i32_0 = arith.constant 0 : i32
    %c0_i32_1 = arith.constant 0 : i32
    return %c0_i32, %c0_i32_0 : i32, i32
  }
  func.func @transform_2(%arg0: i32) -> (i32, i32) {
    %c0_i32 = arith.constant 0 : i32
    %c0_i32_0 = arith.constant 0 : i32
    %c0_i32_1 = arith.constant 0 : i32
    return %c0_i32, %c0_i32_0 : i32, i32
  }
  func.func @transform_3(%arg0: i32) -> (i32, i32) {
    %c0_i32 = arith.constant 0 : i32
    %c0_i32_0 = arith.constant 0 : i32
    %c0_i32_1 = arith.constant 0 : i32
    return %c0_i32, %c0_i32_0 : i32, i32
  }
  func.func @transform_4(%arg0: i32) -> (i32, i32) {
    %c0_i32 = arith.constant 0 : i32
    %c0_i32_0 = arith.constant 0 : i32
    %c0_i32_1 = arith.constant 0 : i32
    return %c0_i32, %c0_i32_0 : i32, i32
  }
  func.func @transform_5(%arg0: i32) -> (i32, i32) {
    %c0_i32 = arith.constant 0 : i32
    %c0_i32_0 = arith.constant 0 : i32
    %c0_i32_1 = arith.constant 0 : i32
    return %c0_i32, %c0_i32_0 : i32, i32
  }
  func.func @transform_6(%arg0: i32) -> (i32, i32) {
    %c0_i32 = arith.constant 0 : i32
    %c0_i32_0 = arith.constant 0 : i32
    %c0_i32_1 = arith.constant 0 : i32
    return %c0_i32, %c0_i32_0 : i32, i32
  }
  func.func @transform_7(%arg0: i32) -> (i32, i32) {
    %c0_i32 = arith.constant 0 : i32
    %c0_i32_0 = arith.constant 0 : i32
    %c0_i32_1 = arith.constant 0 : i32
    return %c0_i32, %c0_i32_0 : i32, i32
  }
  func.func @transform_8(%arg0: i32) -> (i32, i32) {
    %c0_i32 = arith.constant 0 : i32
    %c0_i32_0 = arith.constant 0 : i32
    %c0_i32_1 = arith.constant 0 : i32
    return %c0_i32, %c0_i32_0 : i32, i32
  }
  func.func @transform_9(%arg0: i32) -> (i32, i32) {
    %c0_i32 = arith.constant 0 : i32
    %c0_i32_0 = arith.constant 0 : i32
    return %arg0, %c0_i32 : i32, i32
  }
}

</mosaic_0001>

<bundles_post_ra>
// kernel: convnet_forward.1
= control target key start
LH: loop header
LB: loop body
LE: loop exit
PB: predicated region body
PF: predicated region fallthrough
CT: control target
= control target key end

     0   :  { %s3095_s19 = smov 28   ;;  %s3096_s20 = smov 84   ;;  %vm643_vm0 = vcmask 1045504   ;;  %vm376_vm1 = vcmask 228352   ;;  %vm401_vm2 = vcmask 457728   ;;  %vm426_vm3 = vcmask 687104   ;;  %s4293_s0 = inlined_call_operand.vmem [shape: f32[28,8,28], index: 0, kind: input, shape index: {}]   ;;  %s4294_s1 = inlined_call_operand.vmem [shape: bf16[140,240], index: 1, kind: input, shape index: {}]   ;;  %s4295_s3 = inlined_call_operand.vmem [shape: bf16[600,160], index: 3, kind: input, shape index: {}]   ;;  %s4296_s2 = inlined_call_operand.vmem [shape: f32[1,120], index: 2, kind: input, shape index: {}]   ;;  %s4297_s5 = inlined_call_operand.vmem [shape: bf16[320,50], index: 5, kind: input, shape index: {}]   ;;  %s4298_s4 = inlined_call_operand.vmem [shape: f32[1,80], index: 4, kind: input, shape index: {}]   ;;  %s4299_s7 = inlined_call_operand.vmem [shape: bf16[50,128], index: 7, kind: input, shape index: {}]   ;;  %s4300_s6 = inlined_call_operand.vmem [shape: f32[1,50], index: 6, kind: input, shape index: {}]   ;;  %s4301_s8 = inlined_call_operand.vmem [shape: f32[1,128], index: 8, kind: input, shape index: {}]   ;;  %s4302_s9 = inlined_call_operand.vmem [shape: f32[8,128], index: 9, kind: output, shape index: {}]  }
   0x1   :  { %v3162_v0 = vld [vmem:[%s4293_s0 + $0x8] sm:$0xff]  ;;  %v3167_v1 = vld [vmem:[%s4293_s0 + $0x10] sm:$0xff]  ;;  %v3172_v2 = vld [vmem:[%s4293_s0 + $0x18] sm:$0xff]  ;;  %s3097_s21 = smov 56   ;;  %s3098_s26 = smov 112   ;;  %vm451_vm4 = vcmask 916480  }
   0x2   :  { %v2611_v3 = vpack.i.bf16 %v3167_v1, %v3162_v0  ;;  %v3179_v4 = vld [vmem:[%s4293_s0 + $0x20] sm:$0xff]  ;;  %v3184_v5 = vld [vmem:[%s4293_s0 + $0x28] sm:$0xff]  ;;  %v2616_v7 = vpack.i.bf16 %v3172_v2, %v3167_v1  ;;  %v3198_v9 = vld [vmem:[%s4293_s0 + $0x30] sm:$0xff]  ;;  %vm606_vm5 = vcmask 97280   ;;  %vm947_vm6 = vcmask 64512   ;;  %s3100_s15 = smov 120  }
   0x3   :  { %v2621_v6 = vpack.i.bf16 %v3179_v4, %v3172_v2  ;;  %v2626_v8 = vpack.i.bf16 %v3184_v5, %v3179_v4  ;;  %v3203_v10 = vld [vmem:[%s4293_s0 + $0x38] sm:$0xff]  ;;  %v2931_v11 = vld [vmem:[%s4294_s1 + $0x4] ss:$8 sps:$4 sm:$0xff]   ;;  %v2933_v12 = vld [vmem:[%s4294_s1] ss:$8 sps:$4 sm:$0xff]   ;;  %v2641_v14 = vpack.i.bf16 %v3198_v9, %v3184_v5  ;;  %s3102_s16 = smov 96  }
   0x4   :  { %2612 = vrot.lane.b32.xlu0 %v2611_v3, %s3095_s19  ;;  %v2934_v13 = vld [vmem:[%s4294_s1 + $0x14] ss:$8 sps:$4 sm:$0xff]   ;;  %650 = vmatprep.subr.bf16.mxu0 %v2931_v11  ;;  %v2936_v15 = vld [vmem:[%s4294_s1 + $0x10] ss:$8 sps:$4 sm:$0xff]   ;;  %v2646_v16 = vpack.i.bf16 %v3203_v10, %v3198_v9  ;;  %v2937_v17 = vld [vmem:[%s4294_s1 + $0x24] ss:$8 sps:$4 sm:$0xff]  }
   0x5   :  { %2622 = vrot.lane.b32.xlu1 %v2621_v6, %s3096_s20  ;;  %651 = vmatpush1.bf16.msra.mxu0 %v2933_v12  ;;  %v2939_v18 = vld [vmem:[%s4294_s1 + $0x20] ss:$8 sps:$4 sm:$0xff]   ;;  %v2940_v20 = vld [vmem:[%s4294_s1 + $0x34] ss:$8 sps:$4 sm:$0xff]   ;;  %v2942_v23 = vld [vmem:[%s4294_s1 + $0x30] ss:$8 sps:$4 sm:$0xff]  }
   0x6   :  { %652 = vmatprep.subr.bf16.mxu0 %v2934_v13  ;;  %v3235_v19 = vld [vmem:[%s4293_s0 + $0x40] sm:$0xff]  ;;  %v3243_v21 = vld [vmem:[%s4293_s0 + $0x48] sm:$0xff]  ;;  %v3265_v27 = vld [vmem:[%s4293_s0 + $0x50] sm:$0xff]  ;;  %vm1170_vm7 = vcmask 982016   ;;  %vm1187_vm8 = vcmask 850944   ;;  %vm1196_vm9 = vcmask 785408  }
   0x7   :  { %v2661_v22 = vpack.i.bf16 %v3235_v19, %v3203_v10  ;;  %v2666_v24 = vpack.i.bf16 %v3243_v21, %v3235_v19  ;;  %v2943_v25 = vld [vmem:[%s4294_s1 + $0x44] ss:$8 sps:$4 sm:$0xff]   ;;  %v2945_v26 = vld [vmem:[%s4294_s1 + $0x40] ss:$8 sps:$4 sm:$0xff]   ;;  %v2946_v28 = vld [vmem:[%s4294_s1 + $0x54] ss:$8 sps:$4 sm:$0xff]   ;;  %v2681_v30 = vpack.i.bf16 %v3265_v27, %v3243_v21 }
   0x8   :  { %2617 = vrot.lane.b32.xlu0 %v2616_v7, %s3097_s21  ;;  %v3273_v29 = vld [vmem:[%s4293_s0 + $0x58] sm:$0xff]  ;;  %v2949_v33 = vld [vmem:[%s4294_s1 + $0x64] ss:$8 sps:$4 sm:$0xff]   ;;  %v2951_v34 = vld [vmem:[%s4294_s1 + $0x60] ss:$8 sps:$4 sm:$0xff]   ;;  %vm1688_vm10 = vcmask 1043456  }
   0x9   :  { %2627 = vrot.lane.b32.xlu1 %v2626_v8, %s3098_s26  ;;  %653 = vmatpush1.bf16.msra.mxu0 %v2936_v15  ;;  %v2948_v31 = vld [vmem:[%s4294_s1 + $0x50] ss:$8 sps:$4 sm:$0xff]   ;;  %v2686_v32 = vpack.i.bf16 %v3273_v29, %v3265_v27  ;;  %v3295_v35 = vld [vmem:[%s4293_s0 + $0x60] sm:$0xff]  ;;  %v2952_v36 = vld [vmem:[%s4294_s1 + $0x74] ss:$8 sps:$4 sm:$0xff]   ;;  %vm1675_vm11 = vcmask 719872  }
   0xa   :  { %654 = vmatprep.subr.bf16.mxu0 %v2937_v17  ;;  %v3303_v37 = vld [vmem:[%s4293_s0 + $0x68] sm:$0xff]  ;;  %v2701_v38 = vpack.i.bf16 %v3295_v35, %v3273_v29  ;;  %v2954_v39 = vld [vmem:[%s4294_s1 + $0x70] ss:$8 sps:$4 sm:$0xff]   ;;  %v3343_v48 = vld [vmem:[%s4293_s0 + $0x80] sm:$0xff]  ;;  %vm1962_vm12 = vcmask 392192   ;;  %s3107_s23 = smov 32  }
   0xb   :  { %v2706_v40 = vpack.i.bf16 %v3303_v37, %v3295_v35  ;;  %v2955_v41 = vld [vmem:[%s4294_s1 + $0x84] ss:$8 sps:$4 sm:$0x3f]   ;;  %v2957_v42 = vld [vmem:[%s4294_s1 + $0x80] ss:$8 sps:$4 sm:$0x3f]  }
   0xc   :  { %2632 = vrot.lane.b32.xlu0 %v2621_v6, %s3095_s19  ;;  %v3325_v43 = vld [vmem:[%s4293_s0 + $0x70] sm:$0xff]  ;;  %v645_v44 = vsel %vm643_vm0, %v2957_v42, 0  ;;  %v3330_v45 = vld [vmem:[%s4293_s0 + $0x78] sm:$0xff]  ;;  %v3348_v49 = vld [vmem:[%s4293_s0 + $0x88] sm:$0xff]  ;;  %vm2018_vm13 = vcmask 654336   ;;  %vm2020_vm14 = vcmask 261120  }
   0xd   :  { %2637 = vrot.lane.b32.xlu1 %v2626_v8, %s3097_s21  ;;  %655 = vmatpush1.bf16.msra.mxu0 %v2939_v18  ;;  %v2721_v46 = vpack.i.bf16 %v3325_v43, %v3303_v37  ;;  %v2726_v47 = vpack.i.bf16 %v3330_v45, %v3325_v43  ;;  %v2741_v50 = vpack.i.bf16 %v3343_v48, %v3330_v45  ;;  %v3361_v52 = vld [vmem:[%s4293_s0 + $0x90] sm:$0xff]  ;;  %v3366_v53 = vld [vmem:[%s4293_s0 + $0x98] sm:$0xff]  ;;  %v3379_v56 = vld [vmem:[%s4293_s0 + $0xa0] sm:$0xff]  ;;  %vm3108_vm15 = vmmov 0  }
   0xe   :  { %656 = vmatprep.subr.bf16.mxu0 %v2940_v20  ;;  %v2746_v51 = vpack.i.bf16 %v3348_v49, %v3343_v48  ;;  %v2761_v54 = vpack.i.bf16 %v3361_v52, %v3348_v49  ;;  %v2766_v55 = vpack.i.bf16 %v3366_v53, %v3361_v52  ;;  %v3384_v57 = vld [vmem:[%s4293_s0 + $0xa8] sm:$0xff]  ;;  %v2781_v58 = vpack.i.bf16 %v3379_v56, %v3366_v53  ;;  %v3397_v60 = vld [vmem:[%s4293_s0 + $0xb0] sm:$0xff]  ;;  %v3402_v61 = vld [vmem:[%s4293_s0 + $0xb8] sm:$0xff] }
   0xf   :  { %v2786_v59 = vpack.i.bf16 %v3384_v57, %v3379_v56  ;;  %v2801_v62 = vpack.i.bf16 %v3397_v60, %v3384_v57  ;;  %v2806_v63 = vpack.i.bf16 %v3402_v61, %v3397_v60  ;;  %v57_v3 = vld [vmem:[%s4293_s0 + $0xc0] sm:$0xff]  ;;  %v58_v6 = vld [vmem:[%s4293_s0 + $0xc8] sm:$0xff]  ;;  %v59_v11 = vld [vmem:[%s4293_s0 + $0xd0] sm:$0xff] }
  0x10   :  { %2642 = vrot.lane.b32.xlu0 %v2641_v14, %s3096_s20  ;;  %v2821_v7 = vpack.i.bf16 %v57_v3, %v3402_v61  ;;  %v2826_v8 = vpack.i.bf16 %v58_v6, %v57_v3  ;;  %v60_v12 = vld [vmem:[%s4293_s0 + $0xd8] sm:$0xff]  ;;  %v2841_v13 = vpack.i.bf16 %v59_v11, %v58_v6  ;;  %v33_v20 = vld [vmem:[%s4293_s0] sm:$0xff]  ;;  %s3099_s0 = smov 8  }
  0x11   :  { %2647 = vrot.lane.b32.xlu1 %v2646_v16, %s3098_s26  ;;  %657 = vmatpush1.bf16.msra.mxu0 %v2942_v23 }
  0x12   :  { %658 = vmatprep.subr.bf16.mxu0 %v2943_v25 }
  0x14   :  { %2652 = vrot.lane.b32.xlu0 %v2641_v14, %s3095_s19  ;;  %v2846_v14 = vpack.i.bf16 %v60_v12, %v59_v11 }
  0x15   :  { %2657 = vrot.lane.b32.xlu1 %v2646_v16, %s3097_s21  ;;  %659 = vmatpush1.bf16.msra.mxu0 %v2945_v26 }
  0x16   :  { %660 = vmatprep.subr.bf16.mxu0 %v2946_v28 }
  0x18   :  { %2662 = vrot.lane.b32.xlu0 %v2661_v22, %s3096_s20 }
  0x19   :  { %2667 = vrot.lane.b32.xlu1 %v2666_v24, %s3098_s26  ;;  %661 = vmatpush1.bf16.msra.mxu0 %v2948_v31 }
  0x1a   :  { %662 = vmatprep.subr.bf16.mxu0 %v2949_v33 }
  0x1c   :  { %2672 = vrot.lane.b32.xlu0 %v2661_v22, %s3095_s19 }
  0x1d   :  { %2677 = vrot.lane.b32.xlu1 %v2666_v24, %s3097_s21  ;;  %663 = vmatpush1.bf16.msra.mxu0 %v2951_v34 }
  0x1e   :  { %664 = vmatprep.subr.bf16.mxu0 %v2952_v36 }
  0x20   :  { %2682 = vrot.lane.b32.xlu0 %v2681_v30, %s3096_s20 }
  0x21   :  { %2687 = vrot.lane.b32.xlu1 %v2686_v32, %s3098_s26  ;;  %665 = vmatpush1.bf16.msra.mxu0 %v2954_v39 }
  0x22   :  { %2385 = vmatprep.subr.msk.bf16.mxu0 %vm643_vm0, %v2955_v41  ;;  %vm2193_vm0 = vcmask 523264  }
  0x24   :  { %2692 = vrot.lane.b32.xlu0 %v2681_v30, %s3095_s19 }
  0x25   :  { %2697 = vrot.lane.b32.xlu1 %v2686_v32, %s3097_s21  ;;  %667 = vmatpush1.bf16.msra.mxu0 %v645_v44 }
  0x28   :  { %2702 = vrot.lane.b32.xlu0 %v2701_v38, %s3096_s20 }
  0x29   :  { %2707 = vrot.lane.b32.xlu1 %v2706_v40, %s3098_s26 }
  0x2c   :  { %2712 = vrot.lane.b32.xlu0 %v2701_v38, %s3095_s19 }
  0x2d   :  { %2717 = vrot.lane.b32.xlu1 %v2706_v40, %s3097_s21 }
  0x30   :  { %2722 = vrot.lane.b32.xlu0 %v2721_v46, %s3096_s20 }
  0x31   :  { %2727 = vrot.lane.b32.xlu1 %v2726_v47, %s3098_s26 }
  0x34   :  { %2732 = vrot.lane.b32.xlu0 %v2721_v46, %s3095_s19 }
  0x35   :  { %2737 = vrot.lane.b32.xlu1 %v2726_v47, %s3097_s21 }
  0x38   :  { %2742 = vrot.lane.b32.xlu0 %v2741_v50, %s3096_s20 }
  0x39   :  { %2747 = vrot.lane.b32.xlu1 %v2746_v51, %s3098_s26 }
  0x3c   :  { %2752 = vrot.lane.b32.xlu0 %v2741_v50, %s3095_s19 }
  0x3d   :  { %2757 = vrot.lane.b32.xlu1 %v2746_v51, %s3097_s21 }
  0x40   :  { %2762 = vrot.lane.b32.xlu0 %v2761_v54, %s3096_s20 }
  0x41   :  { %2767 = vrot.lane.b32.xlu1 %v2766_v55, %s3098_s26 }
  0x44   :  { %2772 = vrot.lane.b32.xlu0 %v2761_v54, %s3095_s19 }
  0x45   :  { %2777 = vrot.lane.b32.xlu1 %v2766_v55, %s3097_s21 }
  0x48   :  { %2782 = vrot.lane.b32.xlu0 %v2781_v58, %s3096_s20 }
  0x49   :  { %2787 = vrot.lane.b32.xlu1 %v2786_v59, %s3098_s26 }
  0x4c   :  { %2792 = vrot.lane.b32.xlu0 %v2781_v58, %s3095_s19 }
  0x4d   :  { %2797 = vrot.lane.b32.xlu1 %v2786_v59, %s3097_s21 }
  0x50   :  { %2802 = vrot.lane.b32.xlu0 %v2801_v62, %s3096_s20 }
  0x51   :  { %2807 = vrot.lane.b32.xlu1 %v2806_v63, %s3098_s26 }
  0x54   :  { %2812 = vrot.lane.b32.xlu0 %v2801_v62, %s3095_s19 }
  0x55   :  { %2817 = vrot.lane.b32.xlu1 %v2806_v63, %s3097_s21 }
  0x58   :  { %2822 = vrot.lane.b32.xlu0 %v2821_v7, %s3096_s20 }
  0x59   :  { %2827 = vrot.lane.b32.xlu1 %v2826_v8, %s3098_s26 }
  0x5c   :  { %2832 = vrot.lane.b32.xlu0 %v2821_v7, %s3095_s19 }
  0x5d   :  { %2837 = vrot.lane.b32.xlu1 %v2826_v8, %s3097_s21 }
  0x60   :  { %2842 = vrot.lane.b32.xlu0 %v2841_v13, %s3096_s20 }
  0x61   :  { %2847 = vrot.lane.b32.xlu1 %v2846_v14, %s3098_s26 }
  0x76   :  { %v2613_v15 = vpop.permute.xlu0 %2612 }
  0x77   :  { %v2623_v16 = vpop.permute.xlu1 %2622  ;;  %v2615_v17 = vunpack.i.h.bf16 %v2613_v15  ;;  %v2614_v18 = vunpack.i.l.bf16 %v2613_v15 }
  0x78   :  { %v2625_v23 = vunpack.i.h.bf16 %v2623_v16  ;;  %v2624_v24 = vunpack.i.l.bf16 %v2623_v16 }
  0x79   :  { %v378_v30 = vsel %vm376_vm1, %v3162_v0, %v2615_v17  ;;  %v377_v31 = vsel %vm376_vm1, %v33_v20, %v2614_v18 }
  0x7a   :  { %v2618_v22 = vpop.permute.xlu0 %2617 }
  0x7b   :  { %v2620_v25 = vunpack.i.h.bf16 %v2618_v22  ;;  %v2619_v26 = vunpack.i.l.bf16 %v2618_v22  ;;  %v2628_v28 = vpop.permute.xlu1 %2627 }
  0x7c   :  { %v2630_v32 = vunpack.i.h.bf16 %v2628_v28  ;;  %v2629_v33 = vunpack.i.l.bf16 %v2628_v28 }
  0x7d   :  { %v402_v34 = vsel %vm401_vm2, %v377_v31, %v2619_v26  ;;  %v403_v36 = vsel %vm401_vm2, %v378_v30, %v2620_v25 }
  0x7e   :  { %v2633_v38 = vpop.permute.xlu0 %2632  ;;  %v477_v39 = vpack.c.bf16 %v2630_v32, %v2629_v33  ;;  %v427_v40 = vsel %vm426_vm3, %v402_v34, %v2624_v24  ;;  %v428_v41 = vsel %vm426_vm3, %v403_v36, %v2625_v23 }
  0x7f   :  { %v2635_v42 = vunpack.i.h.bf16 %v2633_v38  ;;  %v2634_v44 = vunpack.i.l.bf16 %v2633_v38  ;;  %v2638_v46 = vpop.permute.xlu1 %2637  ;;  %v452_v0 = vsel %vm451_vm4, %v427_v40, %v2629_v33  ;;  %v453_v47 = vsel %vm451_vm4, %v428_v41, %v2630_v32 }
  0x80   :  { %v2640_v50 = vunpack.i.h.bf16 %v2638_v46  ;;  %v2639_v51 = vunpack.i.l.bf16 %v2638_v46  ;;  %2386 = vmatprep.mubr.msk.bf16.mxu0 %vm606_vm5, %v477_v39  ;;  %v476_v54 = vpack.c.bf16 %v453_v47, %v452_v0 }
  0x81   :  { %v380_v55 = vsel %vm376_vm1, %v3172_v2, %v2635_v42  ;;  %v379_v58 = vsel %vm376_vm1, %v3167_v1, %v2634_v44 }
  0x82   :  { %v404_v59 = vsel %vm401_vm2, %v379_v58, %v2639_v51  ;;  %v405_v62 = vsel %vm401_vm2, %v380_v55, %v2640_v50  ;;  %v2643_v63 = vpop.permute.xlu0 %2642  ;;  %683 = vmatmul.mubr.bf16.vlgmr.msra.gmra.mrb[0].mxu0 %v476_v54 }
  0x83   :  { %v2645_v3 = vunpack.i.h.bf16 %v2643_v63  ;;  %v2644_v6 = vunpack.i.l.bf16 %v2643_v63  ;;  %v2648_v7 = vpop.permute.xlu1 %2647 }
  0x84   :  { %v2650_v8 = vunpack.i.h.bf16 %v2648_v7  ;;  %v2649_v11 = vunpack.i.l.bf16 %v2648_v7 }
  0x85   :  { %v429_v12 = vsel %vm426_vm3, %v404_v59, %v2644_v6  ;;  %v430_v13 = vsel %vm426_vm3, %v405_v62, %v2645_v3 }
  0x86   :  { %v479_v14 = vpack.c.bf16 %v2650_v8, %v2649_v11  ;;  %v2653_v2 = vpop.permute.xlu0 %2652  ;;  %v454_v15 = vsel %vm451_vm4, %v429_v12, %v2649_v11  ;;  %v455_v1 = vsel %vm451_vm4, %v430_v13, %v2650_v8 }
  0x87   :  { %v2655_v16 = vunpack.i.h.bf16 %v2653_v2  ;;  %v2654_v17 = vunpack.i.l.bf16 %v2653_v2  ;;  %v2658_v18 = vpop.permute.xlu1 %2657  ;;  %v478_v20 = vpack.c.bf16 %v455_v1, %v454_v15 }
  0x88   :  { %v2660_v22 = vunpack.i.h.bf16 %v2658_v18  ;;  %v2659_v23 = vunpack.i.l.bf16 %v2658_v18  ;;  %2387 = vmatprep.mubr.msk.bf16.mxu0 %vm606_vm5, %v479_v14 }
  0x89   :  { %v382_v24 = vsel %vm376_vm1, %v3184_v5, %v2655_v16  ;;  %v381_v25 = vsel %vm376_vm1, %v3179_v4, %v2654_v17 }
  0x8a   :  { %v406_v26 = vsel %vm401_vm2, %v381_v25, %v2659_v23  ;;  %v407_v28 = vsel %vm401_vm2, %v382_v24, %v2660_v22  ;;  %v2663_v30 = vpop.permute.xlu0 %2662  ;;  %693 = vmatmul.mubr.bf16.gmra.mrb[4].mxu0 %v478_v20 }
  0x8b   :  { %v2665_v31 = vunpack.i.h.bf16 %v2663_v30  ;;  %v2664_v32 = vunpack.i.l.bf16 %v2663_v30  ;;  %v2668_v33 = vpop.permute.xlu1 %2667 }
  0x8c   :  { %v2670_v34 = vunpack.i.h.bf16 %v2668_v33  ;;  %v2669_v36 = vunpack.i.l.bf16 %v2668_v33 }
  0x8d   :  { %v431_v38 = vsel %vm426_vm3, %v406_v26, %v2664_v32  ;;  %v432_v39 = vsel %vm426_vm3, %v407_v28, %v2665_v31 }
  0x8e   :  { %v481_v40 = vpack.c.bf16 %v2670_v34, %v2669_v36  ;;  %v2673_v5 = vpop.permute.xlu0 %2672  ;;  %v456_v41 = vsel %vm451_vm4, %v431_v38, %v2669_v36  ;;  %v457_v4 = vsel %vm451_vm4, %v432_v39, %v2670_v34 }
  0x8f   :  { %v2675_v42 = vunpack.i.h.bf16 %v2673_v5  ;;  %v2674_v44 = vunpack.i.l.bf16 %v2673_v5  ;;  %v2678_v46 = vpop.permute.xlu1 %2677  ;;  %v480_v0 = vpack.c.bf16 %v457_v4, %v456_v41 }
  0x90   :  { %v2680_v47 = vunpack.i.h.bf16 %v2678_v46  ;;  %v2679_v50 = vunpack.i.l.bf16 %v2678_v46  ;;  %2388 = vmatprep.mubr.msk.bf16.mxu0 %vm606_vm5, %v481_v40 }
  0x91   :  { %v384_v51 = vsel %vm376_vm1, %v3203_v10, %v2675_v42  ;;  %v383_v54 = vsel %vm376_vm1, %v3198_v9, %v2674_v44 }
  0x92   :  { %v408_v55 = vsel %vm401_vm2, %v383_v54, %v2679_v50  ;;  %v409_v58 = vsel %vm401_vm2, %v384_v51, %v2680_v47  ;;  %v2683_v59 = vpop.permute.xlu0 %2682  ;;  %703 = vmatmul.mubr.bf16.gmra.mrb[8].mxu0 %v480_v0 }
  0x93   :  { %v2685_v62 = vunpack.i.h.bf16 %v2683_v59  ;;  %v2684_v63 = vunpack.i.l.bf16 %v2683_v59  ;;  %v2688_v3 = vpop.permute.xlu1 %2687 }
  0x94   :  { %v2690_v6 = vunpack.i.h.bf16 %v2688_v3  ;;  %v2689_v7 = vunpack.i.l.bf16 %v2688_v3 }
  0x95   :  { %v433_v8 = vsel %vm426_vm3, %v408_v55, %v2684_v63  ;;  %v434_v11 = vsel %vm426_vm3, %v409_v58, %v2685_v62 }
  0x96   :  { %v483_v12 = vpack.c.bf16 %v2690_v6, %v2689_v7  ;;  %v458_v10 = vsel %vm451_vm4, %v433_v8, %v2689_v7  ;;  %v459_v9 = vsel %vm451_vm4, %v434_v11, %v2690_v6  ;;  %v2693_v13 = vpop.permute.xlu0 %2692 }
  0x97   :  { %v482_v14 = vpack.c.bf16 %v459_v9, %v458_v10  ;;  %v2695_v2 = vunpack.i.h.bf16 %v2693_v13  ;;  %v2694_v15 = vunpack.i.l.bf16 %v2693_v13  ;;  %v2698_v1 = vpop.permute.xlu1 %2697 }
  0x98   :  { %2389 = vmatprep.mubr.msk.bf16.mxu0 %vm606_vm5, %v483_v12  ;;  %v2700_v16 = vunpack.i.h.bf16 %v2698_v1  ;;  %v2699_v17 = vunpack.i.l.bf16 %v2698_v1 }
  0x99   :  { %v386_v18 = vsel %vm376_vm1, %v3243_v21, %v2695_v2  ;;  %v385_v20 = vsel %vm376_vm1, %v3235_v19, %v2694_v15 }
  0x9a   :  { %713 = vmatmul.mubr.bf16.gmra.mrb[12].mxu0 %v482_v14  ;;  %v410_v22 = vsel %vm401_vm2, %v385_v20, %v2699_v17  ;;  %v411_v23 = vsel %vm401_vm2, %v386_v18, %v2700_v16  ;;  %v2703_v24 = vpop.permute.xlu0 %2702 }
  0x9b   :  { %v2705_v25 = vunpack.i.h.bf16 %v2703_v24  ;;  %v2704_v26 = vunpack.i.l.bf16 %v2703_v24  ;;  %v2708_v28 = vpop.permute.xlu1 %2707 }
  0x9c   :  { %v2710_v30 = vunpack.i.h.bf16 %v2708_v28  ;;  %v2709_v31 = vunpack.i.l.bf16 %v2708_v28 }
  0x9d   :  { %v435_v32 = vsel %vm426_vm3, %v410_v22, %v2704_v26  ;;  %v436_v33 = vsel %vm426_vm3, %v411_v23, %v2705_v25 }
  0x9e   :  { %v485_v34 = vpack.c.bf16 %v2710_v30, %v2709_v31  ;;  %v2713_v21 = vpop.permute.xlu0 %2712  ;;  %v460_v36 = vsel %vm451_vm4, %v435_v32, %v2709_v31  ;;  %v461_v19 = vsel %vm451_vm4, %v436_v33, %v2710_v30 }
  0x9f   :  { %v2715_v38 = vunpack.i.h.bf16 %v2713_v21  ;;  %v2714_v39 = vunpack.i.l.bf16 %v2713_v21  ;;  %v2718_v40 = vpop.permute.xlu1 %2717  ;;  %v484_v5 = vpack.c.bf16 %v461_v19, %v460_v36 }
  0xa0   :  { %v2720_v41 = vunpack.i.h.bf16 %v2718_v40  ;;  %v2719_v4 = vunpack.i.l.bf16 %v2718_v40  ;;  %2390 = vmatprep.mubr.msk.bf16.mxu0 %vm606_vm5, %v485_v34 }
  0xa1   :  { %v388_v42 = vsel %vm376_vm1, %v3273_v29, %v2715_v38  ;;  %v387_v44 = vsel %vm376_vm1, %v3265_v27, %v2714_v39 }
  0xa2   :  { %v412_v46 = vsel %vm401_vm2, %v387_v44, %v2719_v4  ;;  %v413_v0 = vsel %vm401_vm2, %v388_v42, %v2720_v41  ;;  %723 = vmatmul.mubr.bf16.gmra.mrb[16].mxu0 %v484_v5  ;;  %v2723_v47 = vpop.permute.xlu0 %2722 }
  0xa3   :  { %v2725_v50 = vunpack.i.h.bf16 %v2723_v47  ;;  %v2724_v51 = vunpack.i.l.bf16 %v2723_v47  ;;  %v2728_v54 = vpop.permute.xlu1 %2727 }
  0xa4   :  { %v2730_v55 = vunpack.i.h.bf16 %v2728_v54  ;;  %v2729_v58 = vunpack.i.l.bf16 %v2728_v54 }
  0xa5   :  { %v437_v59 = vsel %vm426_vm3, %v412_v46, %v2724_v51  ;;  %v438_v62 = vsel %vm426_vm3, %v413_v0, %v2725_v50 }
  0xa6   :  { %v487_v63 = vpack.c.bf16 %v2730_v55, %v2729_v58  ;;  %v2733_v29 = vpop.permute.xlu0 %2732  ;;  %v462_v3 = vsel %vm451_vm4, %v437_v59, %v2729_v58  ;;  %v463_v27 = vsel %vm451_vm4, %v438_v62, %v2730_v55 }
  0xa7   :  { %v2735_v6 = vunpack.i.h.bf16 %v2733_v29  ;;  %v2734_v7 = vunpack.i.l.bf16 %v2733_v29  ;;  %v2738_v8 = vpop.permute.xlu1 %2737  ;;  %v486_v11 = vpack.c.bf16 %v463_v27, %v462_v3 }
  0xa8   :  { %v2740_v12 = vunpack.i.h.bf16 %v2738_v8  ;;  %v2739_v10 = vunpack.i.l.bf16 %v2738_v8  ;;  %2391 = vmatprep.mubr.msk.bf16.mxu0 %vm606_vm5, %v487_v63 }
  0xa9   :  { %v390_v9 = vsel %vm376_vm1, %v3303_v37, %v2735_v6  ;;  %v389_v13 = vsel %vm376_vm1, %v3295_v35, %v2734_v7 }
  0xaa   :  { %v414_v14 = vsel %vm401_vm2, %v389_v13, %v2739_v10  ;;  %v415_v2 = vsel %vm401_vm2, %v390_v9, %v2740_v12  ;;  %733 = vmatmul.mubr.bf16.gmra.mrb[20].mxu0 %v486_v11  ;;  %v2743_v15 = vpop.permute.xlu0 %2742 }
  0xab   :  { %v2745_v1 = vunpack.i.h.bf16 %v2743_v15  ;;  %v2744_v16 = vunpack.i.l.bf16 %v2743_v15  ;;  %v2748_v17 = vpop.permute.xlu1 %2747 }
  0xac   :  { %v2750_v18 = vunpack.i.h.bf16 %v2748_v17  ;;  %v2749_v20 = vunpack.i.l.bf16 %v2748_v17 }
  0xad   :  { %v439_v22 = vsel %vm426_vm3, %v414_v14, %v2744_v16  ;;  %v440_v23 = vsel %vm426_vm3, %v415_v2, %v2745_v1 }
  0xae   :  { %v489_v24 = vpack.c.bf16 %v2750_v18, %v2749_v20  ;;  %v2753_v37 = vpop.permute.xlu0 %2752  ;;  %v464_v25 = vsel %vm451_vm4, %v439_v22, %v2749_v20  ;;  %v465_v35 = vsel %vm451_vm4, %v440_v23, %v2750_v18 }
  0xaf   :  { %v2755_v26 = vunpack.i.h.bf16 %v2753_v37  ;;  %v2754_v28 = vunpack.i.l.bf16 %v2753_v37  ;;  %v2758_v30 = vpop.permute.xlu1 %2757  ;;  %v488_v31 = vpack.c.bf16 %v465_v35, %v464_v25 }
  0xb0   :  { %v2760_v32 = vunpack.i.h.bf16 %v2758_v30  ;;  %v2759_v33 = vunpack.i.l.bf16 %v2758_v30  ;;  %2392 = vmatprep.mubr.msk.bf16.mxu0 %vm606_vm5, %v489_v24 }
  0xb1   :  { %v392_v34 = vsel %vm376_vm1, %v3330_v45, %v2755_v26  ;;  %v391_v21 = vsel %vm376_vm1, %v3325_v43, %v2754_v28 }
  0xb2   :  { %v416_v36 = vsel %vm401_vm2, %v391_v21, %v2759_v33  ;;  %v417_v19 = vsel %vm401_vm2, %v392_v34, %v2760_v32  ;;  %743 = vmatmul.mubr.bf16.gmra.mrb[24].mxu0 %v488_v31  ;;  %v2763_v38 = vpop.permute.xlu0 %2762 }
  0xb3   :  { %v2765_v39 = vunpack.i.h.bf16 %v2763_v38  ;;  %v2764_v40 = vunpack.i.l.bf16 %v2763_v38  ;;  %v2768_v5 = vpop.permute.xlu1 %2767 }
  0xb4   :  { %v2770_v41 = vunpack.i.h.bf16 %v2768_v5  ;;  %v2769_v4 = vunpack.i.l.bf16 %v2768_v5 }
  0xb5   :  { %v441_v42 = vsel %vm426_vm3, %v416_v36, %v2764_v40  ;;  %v442_v44 = vsel %vm426_vm3, %v417_v19, %v2765_v39 }
  0xb6   :  { %v491_v46 = vpack.c.bf16 %v2770_v41, %v2769_v4  ;;  %v2773_v45 = vpop.permute.xlu0 %2772  ;;  %v466_v0 = vsel %vm451_vm4, %v441_v42, %v2769_v4  ;;  %v467_v43 = vsel %vm451_vm4, %v442_v44, %v2770_v41 }
  0xb7   :  { %v2775_v47 = vunpack.i.h.bf16 %v2773_v45  ;;  %v2774_v50 = vunpack.i.l.bf16 %v2773_v45  ;;  %v2778_v51 = vpop.permute.xlu1 %2777  ;;  %v490_v54 = vpack.c.bf16 %v467_v43, %v466_v0 }
  0xb8   :  { %v2780_v55 = vunpack.i.h.bf16 %v2778_v51  ;;  %v2779_v58 = vunpack.i.l.bf16 %v2778_v51  ;;  %2393 = vmatprep.mubr.msk.bf16.mxu0 %vm606_vm5, %v491_v46 }
  0xb9   :  { %v394_v59 = vsel %vm376_vm1, %v3348_v49, %v2775_v47  ;;  %v393_v62 = vsel %vm376_vm1, %v3343_v48, %v2774_v50 }
  0xba   :  { %v418_v63 = vsel %vm401_vm2, %v393_v62, %v2779_v58  ;;  %v419_v29 = vsel %vm401_vm2, %v394_v59, %v2780_v55  ;;  %753 = vmatmul.mubr.bf16.gmra.mrb[28].mxu0 %v490_v54  ;;  %v2783_v3 = vpop.permute.xlu0 %2782 }
  0xbb   :  { %v2785_v27 = vunpack.i.h.bf16 %v2783_v3  ;;  %v2784_v6 = vunpack.i.l.bf16 %v2783_v3  ;;  %v2788_v7 = vpop.permute.xlu1 %2787 }
  0xbc   :  { %v2790_v8 = vunpack.i.h.bf16 %v2788_v7  ;;  %v2789_v11 = vunpack.i.l.bf16 %v2788_v7 }
  0xbd   :  { %v443_v12 = vsel %vm426_vm3, %v418_v63, %v2784_v6  ;;  %v444_v10 = vsel %vm426_vm3, %v419_v29, %v2785_v27 }
  0xbe   :  { %v493_v9 = vpack.c.bf16 %v2790_v8, %v2789_v11  ;;  %v2793_v49 = vpop.permute.xlu0 %2792  ;;  %v468_v13 = vsel %vm451_vm4, %v443_v12, %v2789_v11  ;;  %v469_v48 = vsel %vm451_vm4, %v444_v10, %v2790_v8 }
  0xbf   :  { %v2795_v14 = vunpack.i.h.bf16 %v2793_v49  ;;  %v2794_v2 = vunpack.i.l.bf16 %v2793_v49  ;;  %v2798_v15 = vpop.permute.xlu1 %2797  ;;  %v492_v1 = vpack.c.bf16 %v469_v48, %v468_v13 }
  0xc0   :  { %v2800_v16 = vunpack.i.h.bf16 %v2798_v15  ;;  %v2799_v17 = vunpack.i.l.bf16 %v2798_v15  ;;  %2394 = vmatprep.mubr.msk.bf16.mxu0 %vm606_vm5, %v493_v9 }
  0xc1   :  { %v396_v18 = vsel %vm376_vm1, %v3366_v53, %v2795_v14  ;;  %v395_v20 = vsel %vm376_vm1, %v3361_v52, %v2794_v2 }
  0xc2   :  { %v420_v22 = vsel %vm401_vm2, %v395_v20, %v2799_v17  ;;  %v421_v23 = vsel %vm401_vm2, %v396_v18, %v2800_v16  ;;  %763 = vmatmul.mubr.bf16.gmra.mrb[32].mxu0 %v492_v1  ;;  %v2803_v24 = vpop.permute.xlu0 %2802 }
  0xc3   :  { %v2805_v37 = vunpack.i.h.bf16 %v2803_v24  ;;  %v2804_v25 = vunpack.i.l.bf16 %v2803_v24  ;;  %v2808_v35 = vpop.permute.xlu1 %2807 }
  0xc4   :  { %v2810_v26 = vunpack.i.h.bf16 %v2808_v35  ;;  %v2809_v28 = vunpack.i.l.bf16 %v2808_v35 }
  0xc5   :  { %v445_v30 = vsel %vm426_vm3, %v420_v22, %v2804_v25  ;;  %v446_v31 = vsel %vm426_vm3, %v421_v23, %v2805_v37 }
  0xc6   :  { %v495_v32 = vpack.c.bf16 %v2810_v26, %v2809_v28  ;;  %v470_v53 = vsel %vm451_vm4, %v445_v30, %v2809_v28  ;;  %v471_v52 = vsel %vm451_vm4, %v446_v31, %v2810_v26  ;;  %v2813_v33 = vpop.permute.xlu0 %2812 }
  0xc7   :  { %v494_v34 = vpack.c.bf16 %v471_v52, %v470_v53  ;;  %v2815_v21 = vunpack.i.h.bf16 %v2813_v33  ;;  %v2814_v36 = vunpack.i.l.bf16 %v2813_v33  ;;  %v2818_v19 = vpop.permute.xlu1 %2817 }
  0xc8   :  { %2395 = vmatprep.mubr.msk.bf16.mxu0 %vm606_vm5, %v495_v32  ;;  %v2820_v38 = vunpack.i.h.bf16 %v2818_v19  ;;  %v2819_v39 = vunpack.i.l.bf16 %v2818_v19 }
  0xc9   :  { %v398_v40 = vsel %vm376_vm1, %v3384_v57, %v2815_v21  ;;  %v397_v5 = vsel %vm376_vm1, %v3379_v56, %v2814_v36 }
  0xca   :  { %773 = vmatmul.mubr.bf16.gmra.mrb[36].mxu0 %v494_v34  ;;  %v422_v41 = vsel %vm401_vm2, %v397_v5, %v2819_v39  ;;  %v423_v4 = vsel %vm401_vm2, %v398_v40, %v2820_v38  ;;  %v2823_v42 = vpop.permute.xlu0 %2822 }
  0xcb   :  { %v2825_v44 = vunpack.i.h.bf16 %v2823_v42  ;;  %v2824_v46 = vunpack.i.l.bf16 %v2823_v42  ;;  %v2828_v45 = vpop.permute.xlu1 %2827 }
  0xcc   :  { %v2830_v0 = vunpack.i.h.bf16 %v2828_v45  ;;  %v2829_v43 = vunpack.i.l.bf16 %v2828_v45 }
  0xcd   :  { %v447_v47 = vsel %vm426_vm3, %v422_v41, %v2824_v46  ;;  %v448_v50 = vsel %vm426_vm3, %v423_v4, %v2825_v44 }
  0xce   :  { %v497_v51 = vpack.c.bf16 %v2830_v0, %v2829_v43  ;;  %v2833_v57 = vpop.permute.xlu0 %2832  ;;  %v472_v54 = vsel %vm451_vm4, %v447_v47, %v2829_v43  ;;  %v473_v56 = vsel %vm451_vm4, %v448_v50, %v2830_v0 }
  0xcf   :  { %v2835_v55 = vunpack.i.h.bf16 %v2833_v57  ;;  %v2834_v58 = vunpack.i.l.bf16 %v2833_v57  ;;  %v2838_v59 = vpop.permute.xlu1 %2837  ;;  %v496_v62 = vpack.c.bf16 %v473_v56, %v472_v54 }
  0xd0   :  { %v2840_v63 = vunpack.i.h.bf16 %v2838_v59  ;;  %v2839_v29 = vunpack.i.l.bf16 %v2838_v59  ;;  %2396 = vmatprep.mubr.msk.bf16.mxu0 %vm606_vm5, %v497_v51 }
  0xd1   :  { %v400_v3 = vsel %vm376_vm1, %v3402_v61, %v2835_v55  ;;  %v399_v27 = vsel %vm376_vm1, %v3397_v60, %v2834_v58  ;;  %v2958_v55 = vld [vmem:[%s4295_s3 + $0x4] ss:$8 sps:$4 sm:$0xff]   ;;  %vm2318_vm1 = vcmask 1040384  }
  0xd2   :  { %v424_v6 = vsel %vm401_vm2, %v399_v27, %v2839_v29  ;;  %v425_v7 = vsel %vm401_vm2, %v400_v3, %v2840_v63  ;;  %783 = vmatmul.mubr.bf16.gmra.mrb[40].mxu0 %v496_v62  ;;  %v2843_v8 = vpop.permute.xlu0 %2842  ;;  %1695 = vmatprep.subr.bf16.mxu1 %v2958_v55  ;;  %v2960_v62 = vld [vmem:[%s4295_s3] ss:$8 sps:$4 sm:$0xff]   ;;  %v2961_v63 = vld [vmem:[%s4295_s3 + $0x14] ss:$8 sps:$4 sm:$0xff]   ;;  %v2963_v29 = vld [vmem:[%s4295_s3 + $0x10] ss:$8 sps:$4 sm:$0xff]  }
  0xd3   :  { %v2845_v11 = vunpack.i.h.bf16 %v2843_v8  ;;  %v2844_v12 = vunpack.i.l.bf16 %v2843_v8  ;;  %v2848_v10 = vpop.permute.xlu1 %2847  ;;  %1696 = vmatpush1.bf16.msra.mxu1 %v2960_v62  ;;  %v2964_v27 = vld [vmem:[%s4295_s3 + $0x24] ss:$8 sps:$4 sm:$0xff]   ;;  %v2997_v62 = vld [vmem:[%s4295_s3 + $0xd4] ss:$8 sps:$4 sm:$0xff]   ;;  %vm2314_vm2 = vcmask 408576  }
  0xd4   :  { %v2850_v9 = vunpack.i.h.bf16 %v2848_v10  ;;  %v2849_v49 = vunpack.i.l.bf16 %v2848_v10  ;;  %1697 = vmatprep.subr.bf16.mxu1 %v2961_v63  ;;  %v2969_v10 = vld [vmem:[%s4295_s3 + $0x30] ss:$8 sps:$4 sm:$0xff]  }
  0xd5   :  { %v449_v13 = vsel %vm426_vm3, %v424_v6, %v2844_v12  ;;  %v450_v48 = vsel %vm426_vm3, %v425_v7, %v2845_v11  ;;  %v2966_v11 = vld [vmem:[%s4295_s3 + $0x20] ss:$8 sps:$4 sm:$0xff]   ;;  %v2967_v12 = vld [vmem:[%s4295_s3 + $0x34] ss:$8 sps:$4 sm:$0xff]  }
  0xd6   :  { %v499_v14 = vpack.c.bf16 %v2850_v9, %v2849_v49  ;;  %v474_v61 = vsel %vm451_vm4, %v449_v13, %v2849_v49  ;;  %v475_v60 = vsel %vm451_vm4, %v450_v48, %v2850_v9  ;;  %v2970_v9 = vld [vmem:[%s4295_s3 + $0x44] ss:$8 sps:$4 sm:$0xff]   ;;  %v2972_v49 = vld [vmem:[%s4295_s3 + $0x40] ss:$8 sps:$4 sm:$0xff]   ;;  %v2973_v13 = vld [vmem:[%s4295_s3 + $0x54] ss:$8 sps:$4 sm:$0xff]  }
  0xd7   :  { %v498_v2 = vpack.c.bf16 %v475_v60, %v474_v61  ;;  %1698 = vmatpush1.bf16.msra.mxu1 %v2963_v29  ;;  %v2975_v48 = vld [vmem:[%s4295_s3 + $0x50] ss:$8 sps:$4 sm:$0xff]   ;;  %v2978_v61 = vld [vmem:[%s4295_s3 + $0x60] ss:$8 sps:$4 sm:$0xff]   ;;  %v2979_v60 = vld [vmem:[%s4295_s3 + $0x74] ss:$8 sps:$4 sm:$0xff]  }
  0xd8   :  { %2397 = vmatprep.mubr.msk.bf16.mxu0 %vm606_vm5, %v499_v14  ;;  %1699 = vmatprep.subr.bf16.mxu1 %v2964_v27  ;;  %v2976_v14 = vld [vmem:[%s4295_s3 + $0x64] ss:$8 sps:$4 sm:$0xff]   ;;  %v2999_v27 = vld [vmem:[%s4295_s3 + $0xd0] ss:$8 sps:$4 sm:$0xff]  }
  0xda   :  { %793 = vmatmul.mubr.bf16.gmra.mrb[44].mxu0 %v498_v2  ;;  %v2981_v2 = vld [vmem:[%s4295_s3 + $0x70] ss:$8 sps:$4 sm:$0xff]  }
  0xdb   :  { %1700 = vmatpush1.bf16.msra.mxu1 %v2966_v11 }
  0xdc   :  { %1701 = vmatprep.subr.bf16.mxu1 %v2967_v12 }
  0xdf   :  { %1702 = vmatpush1.bf16.msra.mxu1 %v2969_v10 }
  0xe0   :  { %1703 = vmatprep.subr.bf16.mxu1 %v2970_v9  ;;  %v3000_v9 = vld [vmem:[%s4295_s3 + $0xe4] ss:$8 sps:$4 sm:$0xff]  }
  0xe3   :  { %1704 = vmatpush1.bf16.msra.mxu1 %v2972_v49  ;;  %v3002_v49 = vld [vmem:[%s4295_s3 + $0xe0] ss:$8 sps:$4 sm:$0xff]  }
  0xe4   :  { %1705 = vmatprep.subr.bf16.mxu1 %v2973_v13 }
  0xe7   :  { %1706 = vmatpush1.bf16.msra.mxu1 %v2975_v48 }
  0xe8   :  { %1707 = vmatprep.subr.bf16.mxu1 %v2976_v14 }
  0xeb   :  { %1708 = vmatpush1.bf16.msra.mxu1 %v2978_v61 }
  0xec   :  { %1709 = vmatprep.subr.bf16.mxu1 %v2979_v60 }
  0xef   :  { %1710 = vmatpush1.bf16.msra.mxu1 %v2981_v2 }
 0x155   :  { %v3567_v15 = vpop.f32.mrb[0].mxu0 }
 0x156   :  { %v686_v1 = vpop.f32.mrb[1].mxu0 }
 0x157   :  { %v3569_v16 = vpop.f32.mrb[2].mxu0 }
 0x158   :  { %v3571_v17 = vpop.f32.mrb[3].mxu0 }
 0x15d   :  { %v3573_v18 = vpop.f32.mrb[4].mxu0 }
 0x15e   :  { %859 = vrot.lane.b32.xlu0 %v3573_v18, %s3099_s0  ;;  %v696_v20 = vpop.f32.mrb[5].mxu0 }
 0x15f   :  { %861 = vrot.lane.b32.xlu1 %v696_v20, %s3099_s0  ;;  %v3578_v22 = vpop.f32.mrb[6].mxu0  ;;  %v2985_v20 = vld [vmem:[%s4295_s3 + $0x94] ss:$8 sps:$4 sm:$0xff]  }
 0x160   :  { %v700_v23 = vpop.f32.mrb[7].mxu0 }
 0x162   :  { %863 = vrot.lane.b32.xlu0 %v3578_v22, %s3099_s0 }
 0x163   :  { %865 = vrot.lane.b32.xlu1 %v700_v23, %s3099_s0  ;;  %v2987_v23 = vld [vmem:[%s4295_s3 + $0x90] ss:$8 sps:$4 sm:$0xff]  }
 0x165   :  { %v3583_v24 = vpop.f32.mrb[8].mxu0 }
 0x166   :  { %867 = vrot.lane.b32.xlu0 %v3583_v24, %s3099_s0  ;;  %v706_v37 = vpop.f32.mrb[9].mxu0 }
 0x167   :  { %869 = vrot.lane.b32.xlu1 %v706_v37, %s3099_s0  ;;  %v3588_v25 = vpop.f32.mrb[10].mxu0  ;;  %v2988_v37 = vld [vmem:[%s4295_s3 + $0xa4] ss:$8 sps:$4 sm:$0xff]  }
 0x168   :  { %v710_v35 = vpop.f32.mrb[11].mxu0 }
 0x16a   :  { %871 = vrot.lane.b32.xlu0 %v3588_v25, %s3099_s0 }
 0x16b   :  { %873 = vrot.lane.b32.xlu1 %v710_v35, %s3099_s0  ;;  %v2990_v35 = vld [vmem:[%s4295_s3 + $0xa0] ss:$8 sps:$4 sm:$0xff]  }
 0x16d   :  { %v3593_v26 = vpop.f32.mrb[12].mxu0 }
 0x16e   :  { %875 = vrot.lane.b32.xlu0 %v3593_v26, %s3099_s0  ;;  %v716_v28 = vpop.f32.mrb[13].mxu0 }
 0x16f   :  { %877 = vrot.lane.b32.xlu1 %v716_v28, %s3099_s0  ;;  %v3598_v30 = vpop.f32.mrb[14].mxu0  ;;  %v2991_v28 = vld [vmem:[%s4295_s3 + $0xb4] ss:$8 sps:$4 sm:$0xff]  }
 0x170   :  { %v720_v31 = vpop.f32.mrb[15].mxu0 }
 0x172   :  { %879 = vrot.lane.b32.xlu0 %v3598_v30, %s3099_s0 }
 0x173   :  { %881 = vrot.lane.b32.xlu1 %v720_v31, %s3099_s0 }
 0x175   :  { %v3603_v32 = vpop.f32.mrb[16].mxu0 }
 0x176   :  { %851 = vrot.lane.b32.xlu0 %v3567_v15, %s3099_s0  ;;  %v726_v53 = vpop.f32.mrb[17].mxu0 }
 0x177   :  { %853 = vrot.lane.b32.xlu1 %v686_v1, %s3099_s0  ;;  %v3608_v52 = vpop.f32.mrb[18].mxu0  ;;  %v2982_v1 = vld [vmem:[%s4295_s3 + $0x84] ss:$8 sps:$4 sm:$0xff]  }
 0x178   :  { %v730_v33 = vpop.f32.mrb[19].mxu0  ;;  %1711 = vmatprep.subr.bf16.mxu1 %v2982_v1  ;;  %v3005_v1 = vld [vmem:[%s4295_s3 + $0xf0] ss:$8 sps:$4 sm:$0xff]  }
 0x17a   :  { %883 = vrot.lane.b32.xlu0 %v3603_v32, %s3099_s0 }
 0x17b   :  { %885 = vrot.lane.b32.xlu1 %v726_v53, %s3099_s0 }
 0x17d   :  { %v3613_v34 = vpop.f32.mrb[20].mxu0 }
 0x17e   :  { %887 = vrot.lane.b32.xlu0 %v3608_v52, %s3099_s0  ;;  %v736_v21 = vpop.f32.mrb[21].mxu0 }
 0x17f   :  { %889 = vrot.lane.b32.xlu1 %v730_v33, %s3099_s0  ;;  %v3618_v36 = vpop.f32.mrb[22].mxu0  ;;  %v2993_v33 = vld [vmem:[%s4295_s3 + $0xb0] ss:$8 sps:$4 sm:$0xff]  }
 0x180   :  { %v740_v19 = vpop.f32.mrb[23].mxu0 }
 0x182   :  { %891 = vrot.lane.b32.xlu0 %v3613_v34, %s3099_s0 }
 0x183   :  { %893 = vrot.lane.b32.xlu1 %v736_v21, %s3099_s0  ;;  %v2994_v21 = vld [vmem:[%s4295_s3 + $0xc4] ss:$8 sps:$4 sm:$0xff]  }
 0x185   :  { %v3623_v38 = vpop.f32.mrb[24].mxu0 }
 0x186   :  { %895 = vrot.lane.b32.xlu0 %v3618_v36, %s3099_s0  ;;  %v746_v39 = vpop.f32.mrb[25].mxu0 }
 0x187   :  { %897 = vrot.lane.b32.xlu1 %v740_v19, %s3099_s0  ;;  %v3628_v40 = vpop.f32.mrb[26].mxu0 }
 0x188   :  { %v750_v5 = vpop.f32.mrb[27].mxu0 }
 0x18a   :  { %899 = vrot.lane.b32.xlu0 %v3623_v38, %s3099_s0 }
 0x18b   :  { %901 = vrot.lane.b32.xlu1 %v746_v39, %s3099_s0 }
 0x18d   :  { %v3633_v41 = vpop.f32.mrb[28].mxu0 }
 0x18e   :  { %903 = vrot.lane.b32.xlu0 %v3628_v40, %s3099_s0  ;;  %v756_v4 = vpop.f32.mrb[29].mxu0 }
 0x18f   :  { %905 = vrot.lane.b32.xlu1 %v750_v5, %s3099_s0  ;;  %v3638_v42 = vpop.f32.mrb[30].mxu0 }
 0x190   :  { %v760_v44 = vpop.f32.mrb[31].mxu0 }
 0x192   :  { %907 = vrot.lane.b32.xlu0 %v3633_v41, %s3099_s0 }
 0x193   :  { %909 = vrot.lane.b32.xlu1 %v756_v4, %s3099_s0 }
 0x195   :  { %v3643_v46 = vpop.f32.mrb[32].mxu0 }
 0x196   :  { %911 = vrot.lane.b32.xlu0 %v3638_v42, %s3099_s0  ;;  %v766_v45 = vpop.f32.mrb[33].mxu0 }
 0x197   :  { %913 = vrot.lane.b32.xlu1 %v760_v44, %s3099_s0  ;;  %v3648_v0 = vpop.f32.mrb[34].mxu0  ;;  %v2996_v44 = vld [vmem:[%s4295_s3 + $0xc0] ss:$8 sps:$4 sm:$0xff]  }
 0x198   :  { %v770_v43 = vpop.f32.mrb[35].mxu0 }
 0x19a   :  { %915 = vrot.lane.b32.xlu0 %v3643_v46, %s3099_s0 }
 0x19b   :  { %917 = vrot.lane.b32.xlu1 %v766_v45, %s3099_s0 }
 0x19d   :  { %v3653_v47 = vpop.f32.mrb[36].mxu0 }
 0x19e   :  { %919 = vrot.lane.b32.xlu0 %v3648_v0, %s3099_s0  ;;  %v776_v50 = vpop.f32.mrb[37].mxu0 }
 0x19f   :  { %921 = vrot.lane.b32.xlu1 %v770_v43, %s3099_s0  ;;  %v3658_v51 = vpop.f32.mrb[38].mxu0 }
 0x1a0   :  { %v780_v57 = vpop.f32.mrb[39].mxu0 }
 0x1a2   :  { %923 = vrot.lane.b32.xlu0 %v3653_v47, %s3099_s0 }
 0x1a3   :  { %925 = vrot.lane.b32.xlu1 %v776_v50, %s3099_s0 }
 0x1a5   :  { %v3663_v54 = vpop.f32.mrb[40].mxu0 }
 0x1a6   :  { %927 = vrot.lane.b32.xlu0 %v3658_v51, %s3099_s0  ;;  %v3667_v56 = vpop.f32.mrb[41].mxu0 }
 0x1a7   :  { %929 = vrot.lane.b32.xlu1 %v780_v57, %s3099_s0  ;;  %v3673_v58 = vpop.f32.mrb[42].mxu0 }
 0x1a8   :  { %v3675_v59 = vpop.f32.mrb[43].mxu0 }
 0x1aa   :  { %855 = vrot.lane.b32.xlu0 %v3569_v16, %s3099_s0 }
 0x1ab   :  { %857 = vrot.lane.b32.xlu1 %v3571_v17, %s3099_s0  ;;  %v2984_v17 = vld [vmem:[%s4295_s3 + $0x80] ss:$8 sps:$4 sm:$0xff]  }
 0x1ac   :  { %1712 = vmatpush1.bf16.msra.mxu1 %v2984_v17 }
 0x1ad   :  { %v3690_v3 = vpop.f32.mrb[44].mxu0  ;;  %1713 = vmatprep.subr.bf16.mxu1 %v2985_v20 }
 0x1ae   :  { %v3695_v6 = vpop.f32.mrb[45].mxu0 }
 0x1af   :  { %v3697_v7 = vpop.f32.mrb[46].mxu0 }
 0x1b0   :  { %v3699_v8 = vpop.f32.mrb[47].mxu0  ;;  %1714 = vmatpush1.bf16.msra.mxu1 %v2987_v23 }
 0x1b1   :  { %1715 = vmatprep.subr.bf16.mxu1 %v2988_v37 }
 0x1b4   :  { %1716 = vmatpush1.bf16.msra.mxu1 %v2990_v35 }
 0x1b5   :  { %1717 = vmatprep.subr.bf16.mxu1 %v2991_v28 }
 0x1b8   :  { %1718 = vmatpush1.bf16.msra.mxu1 %v2993_v33 }
 0x1b9   :  { %1719 = vmatprep.subr.bf16.mxu1 %v2994_v21 }
 0x1bc   :  { %1720 = vmatpush1.bf16.msra.mxu1 %v2996_v44 }
 0x1bd   :  { %1721 = vmatprep.subr.bf16.mxu1 %v2997_v62 }
 0x1c0   :  { %1722 = vmatpush1.bf16.msra.mxu1 %v2999_v27 }
 0x1c1   :  { %1723 = vmatprep.subr.bf16.mxu1 %v3000_v9 }
 0x1c4   :  { %1724 = vmatpush1.bf16.msra.mxu1 %v3002_v49 }
 0x1d0   :  { %v860_v31 = vpop.permute.xlu0 %859 }
 0x1d1   :  { %v862_v53 = vpop.permute.xlu1 %861 }
 0x1d2   :  { %v950_v19 = vsel %vm947_vm6, %v860_v31, %v862_v53  ;;  %v3008_v53 = vld [vmem:[%s4295_s3 + $0x104] ss:$8 sps:$4 sm:$0xff]  }
 0x1d3   :  { %v998_v45 = vmax.f32 %v3573_v18, %v950_v19  ;;  %v3778_v18 = vld [vmem:[%s4296_s2] ss:$0 sm:$0xff] }
 0x1d4   :  { %v864_v39 = vpop.permute.xlu0 %863 }
 0x1d5   :  { %v866_v5 = vpop.permute.xlu1 %865 }
 0x1d6   :  { %v951_v4 = vsel %vm947_vm6, %v864_v39, %v866_v5 }
 0x1d7   :  { %v999_v43 = vmax.f32 %v3578_v22, %v951_v4 }
 0x1d8   :  { %v868_v50 = vpop.permute.xlu0 %867 }
 0x1d9   :  { %v1021_v57 = vmax.f32 %v998_v45, %v999_v43  ;;  %v870_v55 = vpop.permute.xlu1 %869 }
 0x1da   :  { %v952_v63 = vsel %vm947_vm6, %v868_v50, %v870_v55 }
 0x1db   :  { %v1000_v12 = vmax.f32 %v3583_v24, %v952_v63  ;;  %v3790_v61 = vadd.f32 %v3778_v18, %v1021_v57 }
 0x1dc   :  { %v872_v29 = vpop.permute.xlu0 %871 }
 0x1dd   :  { %v874_v11 = vpop.permute.xlu1 %873  ;;  %v1052_v23 = vmax.f32 %v3790_v61, 0.0  ;;  %v3011_v61 = vld [vmem:[%s4295_s3 + $0x114] ss:$8 sps:$4 sm:$0xff]  }
 0x1de   :  { %v953_v22 = vsel %vm947_vm6, %v872_v29, %v874_v11 }
 0x1df   :  { %v1001_v10 = vmax.f32 %v3588_v25, %v953_v22  ;;  %v3003_v25 = vld [vmem:[%s4295_s3 + $0xf4] ss:$8 sps:$4 sm:$0xff]  }
 0x1e0   :  { %v876_v13 = vpop.permute.xlu0 %875  ;;  %1725 = vmatprep.subr.bf16.mxu1 %v3003_v25 }
 0x1e1   :  { %v1022_v48 = vmax.f32 %v1000_v12, %v1001_v10  ;;  %v878_v14 = vpop.permute.xlu1 %877  ;;  %1726 = vmatpush1.bf16.msra.mxu1 %v3005_v1 }
 0x1e2   :  { %v954_v60 = vsel %vm947_vm6, %v876_v13, %v878_v14  ;;  %1768 = vmatprep.subr.bf16.mxu1 %v3008_v53 }
 0x1e3   :  { %v1041_v24 = vadd.f32 %v3778_v18, %v1022_v48  ;;  %v1002_v35 = vmax.f32 %v3593_v26, %v954_v60 }
 0x1e4   :  { %v880_v2 = vpop.permute.xlu0 %879 }
 0x1e5   :  { %v3800_v17 = vmax.f32 %v1041_v24, 0.0  ;;  %v882_v20 = vpop.permute.xlu1 %881 }
 0x1e6   :  { %v955_v37 = vsel %vm947_vm6, %v880_v2, %v882_v20 }
 0x1e7   :  { %v1003_v28 = vmax.f32 %v3598_v30, %v955_v37  ;;  %v2851_v31 = vpack.i.bf16 %v3800_v17, %v1052_v23 }
 0x1e8   :  { %v852_v33 = vpop.permute.xlu0 %851 }
 0x1e9   :  { %v1023_v21 = vmax.f32 %v1002_v35, %v1003_v28  ;;  %v854_v19 = vpop.permute.xlu1 %853  ;;  %2852 = vrot.lane.b32.xlu0 %v2851_v31, %s3100_s15 }
 0x1ea   :  { %v3814_v39 = vsel %vm947_vm6, %v852_v33, %v854_v19 }
 0x1eb   :  { %v1042_v26 = vadd.f32 %v3778_v18, %v1023_v21  ;;  %v996_v30 = vmax.f32 %v3567_v15, %v3814_v39 }
 0x1ec   :  { %v884_v5 = vpop.permute.xlu0 %883 }
 0x1ed   :  { %v3819_v4 = vmax.f32 %v1042_v26, 0.0  ;;  %v886_v44 = vpop.permute.xlu1 %885  ;;  %931 = vrot.lane.b32.xlu0 %v3663_v54, %s3099_s0 }
 0x1ee   :  { %v956_v43 = vsel %vm947_vm6, %v884_v5, %v886_v44 }
 0x1ef   :  { %v2856_v45 = vpack.i.bf16 %v3819_v4, %v3800_v17  ;;  %v1004_v62 = vmax.f32 %v3603_v32, %v956_v43 }
 0x1f0   :  { %v888_v50 = vpop.permute.xlu0 %887 }
 0x1f1   :  { %v890_v57 = vpop.permute.xlu1 %889  ;;  %2857 = vrot.lane.b32.xlu1 %v2856_v45, %s3098_s26  ;;  %935 = vrot.lane.b32.xlu0 %v3673_v58, %s3099_s0 }
 0x1f2   :  { %v957_v55 = vsel %vm947_vm6, %v888_v50, %v890_v57 }
 0x1f3   :  { %v1005_v63 = vmax.f32 %v3608_v52, %v957_v55 }
 0x1f4   :  { %v892_v29 = vpop.permute.xlu0 %891 }
 0x1f5   :  { %v1024_v27 = vmax.f32 %v1004_v62, %v1005_v63  ;;  %v894_v11 = vpop.permute.xlu1 %893  ;;  %933 = vrot.lane.b32.xlu1 %v3667_v56, %s3099_s0  ;;  %939 = vrot.lane.b32.xlu0 %v3690_v3, %s3099_s0 }
 0x1f6   :  { %v958_v12 = vsel %vm947_vm6, %v892_v29, %v894_v11 }
 0x1f7   :  { %v1043_v22 = vadd.f32 %v3778_v18, %v1024_v27  ;;  %v1006_v52 = vmax.f32 %v3613_v34, %v958_v12 }
 0x1f8   :  { %v896_v10 = vpop.permute.xlu0 %895 }
 0x1f9   :  { %v3838_v9 = vmax.f32 %v1043_v22, 0.0  ;;  %v898_v49 = vpop.permute.xlu1 %897  ;;  %937 = vrot.lane.b32.xlu1 %v3675_v59, %s3099_s0  ;;  %943 = vrot.lane.b32.xlu0 %v3697_v7, %s3099_s0 }
 0x1fa   :  { %v959_v32 = vsel %vm947_vm6, %v896_v10, %v898_v49 }
 0x1fb   :  { %v1007_v56 = vmax.f32 %v3618_v36, %v959_v32  ;;  %v3849_v13 = vpack.i.bf16 %v3838_v9, %v3819_v4 }
 0x1fc   :  { %v900_v48 = vpop.permute.xlu0 %899 }
 0x1fd   :  { %v1025_v14 = vmax.f32 %v1006_v52, %v1007_v56  ;;  %v902_v24 = vpop.permute.xlu1 %901  ;;  %941 = vrot.lane.b32.xlu1 %v3695_v6, %s3099_s0  ;;  %2862 = vrot.lane.b32.xlu0 %v3849_v13, %s3100_s15 }
 0x1fe   :  { %v960_v25 = vsel %vm947_vm6, %v900_v48, %v902_v24 }
 0x1ff   :  { %v1044_v59 = vadd.f32 %v3778_v18, %v1025_v14  ;;  %v1008_v1 = vmax.f32 %v3623_v38, %v960_v25 }
 0x200   :  { %v904_v34 = vpop.permute.xlu0 %903 }
 0x201   :  { %v3857_v60 = vmax.f32 %v1044_v59, 0.0  ;;  %v906_v36 = vpop.permute.xlu1 %905  ;;  %945 = vrot.lane.b32.xlu1 %v3699_v8, %s3099_s0  ;;  %s3101_s0 = smov 104  }
 0x202   :  { %v961_v2 = vsel %vm947_vm6, %v904_v34, %v906_v36 }
 0x203   :  { %v1009_v6 = vmax.f32 %v3628_v40, %v961_v2  ;;  %v2866_v20 = vpack.i.bf16 %v3857_v60, %v3838_v9 }
 0x204   :  { %v908_v37 = vpop.permute.xlu0 %907 }
 0x205   :  { %v1026_v35 = vmax.f32 %v1008_v1, %v1009_v6  ;;  %v910_v28 = vpop.permute.xlu1 %909  ;;  %2867 = vrot.lane.b32.xlu1 %v2866_v20, %s3098_s26 }
 0x206   :  { %v962_v53 = vsel %vm947_vm6, %v908_v37, %v910_v28 }
 0x207   :  { %v1045_v31 = vadd.f32 %v3778_v18, %v1026_v35  ;;  %v1010_v40 = vmax.f32 %v3633_v41, %v962_v53 }
 0x208   :  { %v912_v33 = vpop.permute.xlu0 %911 }
 0x209   :  { %v3869_v8 = vmax.f32 %v1045_v31, 0.0  ;;  %v914_v21 = vpop.permute.xlu1 %913 }
 0x20a   :  { %v963_v38 = vsel %vm947_vm6, %v912_v33, %v914_v21 }
 0x20b   :  { %v1011_v19 = vmax.f32 %v3638_v42, %v963_v38  ;;  %v2871_v26 = vpack.i.bf16 %v3869_v8, %v3857_v60 }
 0x20c   :  { %v916_v5 = vpop.permute.xlu0 %915 }
 0x20d   :  { %v1027_v44 = vmax.f32 %v1010_v40, %v1011_v19  ;;  %v918_v45 = vpop.permute.xlu1 %917  ;;  %2872 = vrot.lane.b32.xlu0 %v2871_v26, %s3100_s15  ;;  %v3006_v19 = vld [vmem:[%s4295_s3 + $0x100] ss:$8 sps:$4 sm:$0xff]  }
 0x20e   :  { %v964_v50 = vsel %vm947_vm6, %v916_v5, %v918_v45  ;;  %v3009_v45 = vld [vmem:[%s4295_s3 + $0x110] ss:$8 sps:$4 sm:$0xff]  }
 0x20f   :  { %v1046_v43 = vadd.f32 %v3778_v18, %v1027_v44  ;;  %v1012_v42 = vmax.f32 %v3643_v46, %v964_v50  ;;  %v3014_v50 = vld [vmem:[%s4295_s3 + $0x124] ss:$8 sps:$4 sm:$0xff]  }
 0x210   :  { %v920_v57 = vpop.permute.xlu0 %919 }
 0x211   :  { %v3879_v55 = vmax.f32 %v1046_v43, 0.0  ;;  %v922_v62 = vpop.permute.xlu1 %921 }
 0x212   :  { %v965_v41 = vsel %vm947_vm6, %v920_v57, %v922_v62 }
 0x213   :  { %v1013_v63 = vmax.f32 %v3648_v0, %v965_v41  ;;  %v2876_v29 = vpack.i.bf16 %v3879_v55, %v3869_v8 }
 0x214   :  { %v924_v27 = vpop.permute.xlu0 %923 }
 0x215   :  { %v1028_v11 = vmax.f32 %v1012_v42, %v1013_v63  ;;  %v926_v22 = vpop.permute.xlu1 %925  ;;  %2877 = vrot.lane.b32.xlu1 %v2876_v29, %s3098_s26  ;;  %v3012_v63 = vld [vmem:[%s4295_s3 + $0x120] ss:$8 sps:$4 sm:$0xff]  }
 0x216   :  { %v966_v10 = vsel %vm947_vm6, %v924_v27, %v926_v22 }
 0x217   :  { %v1047_v12 = vadd.f32 %v3778_v18, %v1028_v11  ;;  %v1014_v46 = vmax.f32 %v3653_v47, %v966_v10 }
 0x218   :  { %v928_v49 = vpop.permute.xlu0 %927 }
 0x219   :  { %v1059_v32 = vmax.f32 %v1047_v12, 0.0  ;;  %v930_v52 = vpop.permute.xlu1 %929  ;;  %v3015_v12 = vld [vmem:[%s4295_s3 + $0x130] ss:$8 sps:$4 sm:$0xff]  }
 0x21a   :  { %v967_v56 = vsel %vm947_vm6, %v928_v49, %v930_v52 }
 0x21b   :  { %v1015_v0 = vmax.f32 %v3658_v51, %v967_v56  ;;  %v2881_v48 = vpack.i.bf16 %v1059_v32, %v3879_v55 }
 0x21c   :  { %v856_v14 = vpop.permute.xlu0 %855 }
 0x21d   :  { %v1029_v24 = vmax.f32 %v1014_v46, %v1015_v0  ;;  %v858_v59 = vpop.permute.xlu1 %857  ;;  %2882 = vrot.lane.b32.xlu0 %v2881_v48, %s3100_s15 }
 0x21e   :  { %v949_v25 = vsel %vm947_vm6, %v856_v14, %v858_v59 }
 0x21f   :  { %v3896_v34 = vadd.f32 %v3778_v18, %v1029_v24  ;;  %v997_v36 = vmax.f32 %v3569_v16, %v949_v25  ;;  %v3018_v24 = vld [vmem:[%s4295_s3 + $0x140] ss:$8 sps:$4 sm:$0xff]  }
 0x221   :  { %v1060_v2 = vmax.f32 %v3896_v34, 0.0  ;;  %v1020_v47 = vmax.f32 %v996_v30, %v997_v36  ;;  %2892 = vrot.lane.b32.xlu0 %v3849_v13, %s3101_s0 }
 0x223   :  { %v2886_v51 = vpack.i.bf16 %v1060_v2, %v1059_v32  ;;  %v1039_v16 = vadd.f32 %v3778_v18, %v1020_v47  ;;  %v3020_v32 = vld [vmem:[%s4295_s3 + $0x144] ss:$8 sps:$4 sm:$0xff]  }
 0x225   :  { %2902 = vrot.lane.b32.xlu0 %v2871_v26, %s3101_s0  ;;  %2887 = vrot.lane.b32.xlu1 %v2886_v51, %s3098_s26  ;;  %v1051_v1 = vmax.f32 %v1039_v16, 0.0 }
 0x229   :  { %2912 = vrot.lane.b32.xlu0 %v2881_v48, %s3101_s0  ;;  %2897 = vrot.lane.b32.xlu1 %v2866_v20, %s3102_s16 }
 0x22d   :  { %2907 = vrot.lane.b32.xlu1 %v2876_v29, %s3102_s16  ;;  %v3017_v29 = vld [vmem:[%s4295_s3 + $0x134] ss:$8 sps:$4 sm:$0xff]  }
 0x231   :  { %2917 = vrot.lane.b32.xlu1 %v2886_v51, %s3102_s16 }
 0x25b   :  { %v2853_v15 = vpop.permute.xlu0 %2852 }
 0x25c   :  { %v2855_v30 = vunpack.i.h.bf16 %v2853_v15  ;;  %v2854_v13 = vunpack.i.l.bf16 %v2853_v15 }
 0x25e   :  { %v1171_v20 = vsel %vm1170_vm7, %v1051_v1, %v2854_v13  ;;  %v1172_v31 = vsel %vm1170_vm7, %v1052_v23, %v2855_v30  ;;  %v3027_v1 = vld [vmem:[%s4295_s3 + $0x170] ss:$8 sps:$4 sm:$0xff]  }
 0x25f   :  { %v932_v39 = vpop.permute.xlu0 %931  ;;  %v1205_v26 = vpack.c.bf16 %v1172_v31, %v1171_v20 }
 0x263   :  { %v3914_v6 = vpop.permute.xlu1 %2857  ;;  %v936_v37 = vpop.permute.xlu0 %935 }
 0x264   :  { %v2860_v35 = vunpack.i.h.bf16 %v3914_v6  ;;  %v2859_v28 = vunpack.i.l.bf16 %v3914_v6 }
 0x266   :  { %v1179_v53 = vsel %vm451_vm4, %v2854_v13, %v2859_v28  ;;  %v1180_v33 = vsel %vm451_vm4, %v2855_v30, %v2860_v35  ;;  %v3029_v30 = vld [vmem:[%s4295_s3 + $0x174] ss:$8 sps:$4 sm:$0xff]  }
 0x267   :  { %v934_v21 = vpop.permute.xlu1 %933  ;;  %v940_v38 = vpop.permute.xlu0 %939  ;;  %v1206_v40 = vpack.c.bf16 %v1180_v33, %v1179_v53  ;;  %v3030_v33 = vld [vmem:[%s4295_s3 + $0x180] ss:$8 sps:$4 sm:$0xff]  }
 0x268   :  { %v968_v23 = vsel %vm947_vm6, %v932_v39, %v934_v21  ;;  %v3024_v39 = vld [vmem:[%s4295_s3 + $0x160] ss:$8 sps:$4 sm:$0xff]  }
 0x269   :  { %1727 = vmatprep.mubr.bf16.mxu1 %v1206_v40  ;;  %v1016_v57 = vmax.f32 %v3663_v54, %v968_v23  ;;  %v3035_v40 = vld [vmem:[%s4295_s3 + $0x194] ss:$8 sps:$4 sm:$0xff]  }
 0x26a   :  { %1728 = vmatmul.mubr.bf16.vlgmr.msra.gmra.mrb[0].mxu1 %v1205_v26 }
 0x26b   :  { %1769 = vmatpush1.bf16.msra.mxu1 %v3006_v19  ;;  %v938_v5 = vpop.permute.xlu1 %937  ;;  %v944_v44 = vpop.permute.xlu0 %943 }
 0x26c   :  { %v969_v43 = vsel %vm947_vm6, %v936_v37, %v938_v5  ;;  %1770 = vmatprep.subr.bf16.mxu1 %v3011_v61  ;;  %v3032_v37 = vld [vmem:[%s4295_s3 + $0x184] ss:$8 sps:$4 sm:$0xff]  }
 0x26d   :  { %v1017_v62 = vmax.f32 %v3673_v58, %v969_v43  ;;  %v3036_v43 = vld [vmem:[%s4295_s3 + $0x1a0] ss:$8 sps:$4 sm:$0xff]  }
 0x26f   :  { %v1030_v41 = vmax.f32 %v1016_v57, %v1017_v62  ;;  %1771 = vmatpush1.bf16.msra.mxu1 %v3009_v45  ;;  %v942_v42 = vpop.permute.xlu1 %941  ;;  %v2863_v11 = vpop.permute.xlu0 %2862  ;;  %v3039_v62 = vld [vmem:[%s4295_s3 + $0x1b0] ss:$8 sps:$4 sm:$0xff]  }
 0x270   :  { %1772 = vmatprep.subr.bf16.mxu1 %v3014_v50  ;;  %v970_v22 = vsel %vm947_vm6, %v940_v38, %v942_v42  ;;  %v2865_v10 = vunpack.i.h.bf16 %v2863_v11  ;;  %v2864_v56 = vunpack.i.l.bf16 %v2863_v11  ;;  %v3041_v50 = vld [vmem:[%s4295_s3 + $0x1b4] ss:$8 sps:$4 sm:$0xff]  }
 0x271   :  { %v1049_v27 = vadd.f32 %v3778_v18, %v1030_v41  ;;  %v1018_v52 = vmax.f32 %v3690_v3, %v970_v22 }
 0x272   :  { %v1173_v34 = vsel %vm1170_vm7, %v3800_v17, %v2864_v56  ;;  %v1174_v36 = vsel %vm1170_vm7, %v3819_v4, %v2865_v10  ;;  %v3026_v4 = vld [vmem:[%s4295_s3 + $0x164] ss:$8 sps:$4 sm:$0xff]  }
 0x273   :  { %v1061_v54 = vmax.f32 %v1049_v27, 0.0  ;;  %1773 = vmatpush1.bf16.msra.mxu1 %v3012_v63  ;;  %v946_v58 = vpop.permute.xlu1 %945  ;;  %v1210_v17 = vpack.c.bf16 %v1174_v36, %v1173_v34  ;;  %v3044_v63 = vld [vmem:[%s4295_s3 + $0x1c4] ss:$8 sps:$4 sm:$0xff]  }
 0x274   :  { %v971_v49 = vsel %vm947_vm6, %v944_v44, %v946_v58  ;;  %1774 = vmatprep.subr.bf16.mxu1 %v3017_v29  ;;  %v3033_v44 = vld [vmem:[%s4295_s3 + $0x190] ss:$8 sps:$4 sm:$0xff]  }
 0x275   :  { %v1019_v46 = vmax.f32 %v3697_v7, %v971_v49  ;;  %v2921_v0 = vpack.i.bf16 %v1061_v54, %v1060_v2  ;;  %v3023_v7 = vld [vmem:[%s4295_s3 + $0x154] ss:$8 sps:$4 sm:$0xff]  }
 0x277   :  { %v1031_v48 = vmax.f32 %v1018_v52, %v1019_v46  ;;  %1775 = vmatpush1.bf16.msra.mxu1 %v3015_v12  ;;  %2922 = vrot.lane.b32.xlu0 %v2921_v0, %s3101_s0  ;;  %v3964_v14 = vpop.permute.xlu1 %2867  ;;  %v3042_v12 = vld [vmem:[%s4295_s3 + $0x1c0] ss:$8 sps:$4 sm:$0xff]   ;;  %v3045_v0 = vld [vmem:[%s4295_s3 + $0x1d0] ss:$8 sps:$4 sm:$0xff]  }
 0x278   :  { %v2870_v59 = vunpack.i.h.bf16 %v3964_v14  ;;  %v2869_v3 = vunpack.i.l.bf16 %v3964_v14  ;;  %1776 = vmatprep.subr.bf16.mxu1 %v3020_v32  ;;  %v3063_v14 = vld [vmem:[%s4295_s3 + $0x230] ss:$8 sps:$4 sm:$0xff]  }
 0x279   :  { %v1050_v25 = vadd.f32 %v3778_v18, %v1031_v48  ;;  %v3021_v18 = vld [vmem:[%s4295_s3 + $0x150] ss:$8 sps:$4 sm:$0xff]  }
 0x27a   :  { %v1181_v2 = vsel %vm451_vm4, %v2864_v56, %v2869_v3  ;;  %v1182_v47 = vsel %vm451_vm4, %v2865_v10, %v2870_v59 }
 0x27b   :  { %v1062_v51 = vmax.f32 %v1050_v25, 0.0  ;;  %1777 = vmatpush1.bf16.msra.mxu1 %v3018_v24  ;;  %v1211_v15 = vpack.c.bf16 %v1182_v47, %v1181_v2  ;;  %v3050_v24 = vld [vmem:[%s4295_s3 + $0x1e4] ss:$8 sps:$4 sm:$0xff]   ;;  %v3048_v2 = vld [vmem:[%s4295_s3 + $0x1e0] ss:$8 sps:$4 sm:$0xff]  }
 0x27c   :  { %1778 = vmatprep.subr.bf16.mxu1 %v3023_v7 }
 0x27d   :  { %1737 = vmatprep.mubr.bf16.mxu1 %v1211_v15  ;;  %v2926_v16 = vpack.i.bf16 %v1062_v51, %v1061_v54 }
 0x27e   :  { %1738 = vmatmul.mubr.bf16.gmra.mrb[4].mxu1 %v1210_v17 }
 0x27f   :  { %1779 = vmatpush1.bf16.msra.mxu1 %v3021_v18  ;;  %2927 = vrot.lane.b32.xlu1 %v2926_v16, %s3102_s16  ;;  %v2873_v13 = vpop.permute.xlu0 %2872  ;;  %v3053_v18 = vld [vmem:[%s4295_s3 + $0x1f4] ss:$8 sps:$4 sm:$0xff]  }
 0x280   :  { %1780 = vmatprep.subr.bf16.mxu1 %v3026_v4  ;;  %v2875_v20 = vunpack.i.h.bf16 %v2873_v13  ;;  %v2874_v31 = vunpack.i.l.bf16 %v2873_v13 }
 0x282   :  { %v1175_v19 = vsel %vm1170_vm7, %v3838_v9, %v2874_v31  ;;  %v1176_v26 = vsel %vm1170_vm7, %v3857_v60, %v2875_v20  ;;  %v3038_v9 = vld [vmem:[%s4295_s3 + $0x1a4] ss:$8 sps:$4 sm:$0xff]  }
 0x283   :  { %1781 = vmatpush1.bf16.msra.mxu1 %v3024_v39  ;;  %v1215_v45 = vpack.c.bf16 %v1176_v26, %v1175_v19  ;;  %v3051_v39 = vld [vmem:[%s4295_s3 + $0x1f0] ss:$8 sps:$4 sm:$0xff]   ;;  %v3054_v19 = vld [vmem:[%s4295_s3 + $0x200] ss:$8 sps:$4 sm:$0xff]   ;;  %v3059_v26 = vld [vmem:[%s4295_s3 + $0x214] ss:$8 sps:$4 sm:$0xff]  }
 0x284   :  { %1782 = vmatprep.subr.bf16.mxu1 %v3029_v30 }
 0x287   :  { %1783 = vmatpush1.bf16.msra.mxu1 %v3027_v1  ;;  %v4004_v53 = vpop.permute.xlu1 %2877 }
 0x288   :  { %v2880_v21 = vunpack.i.h.bf16 %v4004_v53  ;;  %v2879_v38 = vunpack.i.l.bf16 %v4004_v53  ;;  %1784 = vmatprep.subr.bf16.mxu1 %v3032_v37 }
 0x28a   :  { %v1183_v61 = vsel %vm451_vm4, %v2874_v31, %v2879_v38  ;;  %v1184_v23 = vsel %vm451_vm4, %v2875_v20, %v2880_v21  ;;  %v3056_v20 = vld [vmem:[%s4295_s3 + $0x204] ss:$8 sps:$4 sm:$0xff]  }
 0x28b   :  { %1785 = vmatpush1.bf16.msra.mxu1 %v3030_v33  ;;  %v1216_v5 = vpack.c.bf16 %v1184_v23, %v1183_v61 }
 0x28c   :  { %1786 = vmatprep.subr.bf16.mxu1 %v3035_v40 }
 0x28d   :  { %1747 = vmatprep.mubr.bf16.mxu1 %v1216_v5  ;;  %v3057_v5 = vld [vmem:[%s4295_s3 + $0x210] ss:$8 sps:$4 sm:$0xff]  }
 0x28e   :  { %1748 = vmatmul.mubr.bf16.gmra.mrb[8].mxu1 %v1215_v45 }
 0x28f   :  { %1787 = vmatpush1.bf16.msra.mxu1 %v3033_v44  ;;  %v2883_v60 = vpop.permute.xlu0 %2882 }
 0x290   :  { %1788 = vmatprep.subr.bf16.mxu1 %v3038_v9  ;;  %v2885_v29 = vunpack.i.h.bf16 %v2883_v60  ;;  %v2884_v27 = vunpack.i.l.bf16 %v2883_v60  ;;  %v3062_v9 = vld [vmem:[%s4295_s3 + $0x224] ss:$8 sps:$4 sm:$0xff]  }
 0x292   :  { %v1177_v6 = vsel %vm1170_vm7, %v3869_v8, %v2884_v27 }
 0x293   :  { %1789 = vmatpush1.bf16.msra.mxu1 %v3036_v43  ;;  %v2893_v57 = vpop.permute.xlu0 %2892 }
 0x294   :  { %v2895_v41 = vunpack.i.h.bf16 %v2893_v57  ;;  %v2894_v42 = vunpack.i.l.bf16 %v2893_v57  ;;  %1790 = vmatprep.subr.bf16.mxu1 %v3041_v50 }
 0x296   :  { %v1189_v11 = vsel %vm1187_vm8, %v2860_v35, %v2895_v41  ;;  %v1188_v22 = vsel %vm1187_vm8, %v2859_v28, %v2894_v42  ;;  %v3047_v35 = vld [vmem:[%s4295_s3 + $0x1d4] ss:$8 sps:$4 sm:$0xff]   ;;  %v1178_v28 = vsel %vm1170_vm7, %v3879_v55, %v2885_v29 }
 0x297   :  { %v1207_v54 = vpack.c.bf16 %v1189_v11, %v1188_v22  ;;  %1791 = vmatpush1.bf16.msra.mxu1 %v3039_v62  ;;  %v4048_v58 = vpop.permute.xlu1 %2887  ;;  %v1220_v55 = vpack.c.bf16 %v1178_v28, %v1177_v6  ;;  %v2903_v17 = vpop.permute.xlu0 %2902  ;;  %v3060_v62 = vld [vmem:[%s4295_s3 + $0x220] ss:$8 sps:$4 sm:$0xff]  }
 0x298   :  { %v2890_v10 = vunpack.i.h.bf16 %v4048_v58  ;;  %v2889_v49 = vunpack.i.l.bf16 %v4048_v58  ;;  %1792 = vmatprep.subr.bf16.mxu1 %v3044_v63  ;;  %v2905_v30 = vunpack.i.h.bf16 %v2903_v17  ;;  %v2904_v13 = vunpack.i.l.bf16 %v2903_v17  ;;  %v3066_v11 = vld [vmem:[%s4295_s3 + $0x240] ss:$8 sps:$4 sm:$0xff]  }
 0x29a   :  { %v1185_v32 = vsel %vm451_vm4, %v2884_v27, %v2889_v49  ;;  %v1186_v52 = vsel %vm451_vm4, %v2885_v29, %v2890_v10  ;;  %v1190_v60 = vsel %vm1187_vm8, %v2869_v3, %v2904_v13  ;;  %v1191_v43 = vsel %vm1187_vm8, %v2870_v59, %v2905_v30  ;;  %v3068_v59 = vld [vmem:[%s4295_s3 + $0x244] ss:$8 sps:$4 sm:$0xff]   ;;  %v1299_v27 = vld [vmem:[%s4295_s3 + $0x250] sm:$0xff] }
 0x29b   :  { %1793 = vmatpush1.bf16.msra.mxu1 %v3042_v12  ;;  %v2898_v56 = vpop.permute.xlu1 %2897  ;;  %v1221_v46 = vpack.c.bf16 %v1186_v52, %v1185_v32  ;;  %v2913_v61 = vpop.permute.xlu0 %2912  ;;  %v2473_v12 = vcombine.low %v1299_v27, %v1299_v27 }
 0x29c   :  { %v2900_v8 = vunpack.i.h.bf16 %v2898_v56  ;;  %v2899_v48 = vunpack.i.l.bf16 %v2898_v56  ;;  %1794 = vmatprep.subr.bf16.mxu1 %v3047_v35  ;;  %v2915_v44 = vunpack.i.h.bf16 %v2913_v61  ;;  %v2914_v45 = vunpack.i.l.bf16 %v2913_v61  ;;  %v3081_v61 = vld [vmem:[%s4297_s5 + $0x68] sm:$0xff]  }
 0x29d   :  { %1757 = vmatprep.mubr.bf16.mxu1 %v1221_v46  ;;  %v1690_v53 = vsel %vm1688_vm10, %v2473_v12, 0 }
 0x29e   :  { %v4074_v7 = vpack.c.bf16 %v2900_v8, %v2899_v48  ;;  %1758 = vmatmul.mubr.bf16.gmra.mrb[12].mxu1 %v1220_v55  ;;  %v1197_v25 = vsel %vm1196_vm9, %v2894_v42, %v2899_v48  ;;  %v1198_v34 = vsel %vm1196_vm9, %v2895_v41, %v2900_v8  ;;  %v1212_v41 = vpack.c.bf16 %v1191_v43, %v1190_v60  ;;  %v3065_v42 = vld [vmem:[%s4295_s3 + $0x234] ss:$8 sps:$4 sm:$0xff]   ;;  %s3104_s3 = smov 48  }
 0x29f   :  { %1795 = vmatpush1.bf16.msra.mxu1 %v3045_v0  ;;  %v2908_v36 = vpop.permute.xlu1 %2907  ;;  %v1208_v47 = vpack.c.bf16 %v1198_v34, %v1197_v25  ;;  %v1192_v63 = vsel %vm1187_vm8, %v2879_v38, %v2914_v45  ;;  %v1193_v29 = vsel %vm1187_vm8, %v2880_v21, %v2915_v44  ;;  %v3103_v55 = vmov 0   ;;  %v3085_v60 = vld [vmem:[%s4297_s5 + $0x78] sm:$0xff]  }
 0x2a0   :  { %v2910_v51 = vunpack.i.h.bf16 %v2908_v36  ;;  %v2909_v15 = vunpack.i.l.bf16 %v2908_v36  ;;  %1796 = vmatprep.subr.bf16.mxu1 %v3050_v24  ;;  %v1217_v22 = vpack.c.bf16 %v1193_v29, %v1192_v63  ;;  %v3086_v29 = vld [vmem:[%s4297_s5 + $0x38] sm:$0xff]  }
 0x2a1   :  { %1800 = vmatprep.mubr.bf16.mxu1 %v1208_v47 }
 0x2a2   :  { %v4084_v4 = vpack.c.bf16 %v2910_v51, %v2909_v15  ;;  %v1199_v33 = vsel %vm1196_vm9, %v2904_v13, %v2909_v15  ;;  %v1200_v40 = vsel %vm1196_vm9, %v2905_v30, %v2910_v51  ;;  %v3071_v30 = vld [vmem:[%s4297_s5 + $0x40] sm:$0xff]  }
 0x2a3   :  { %1797 = vmatpush1.bf16.msra.mxu1 %v3048_v2  ;;  %v2918_v16 = vpop.permute.xlu1 %2917  ;;  %v1213_v23 = vpack.c.bf16 %v1200_v40, %v1199_v33  ;;  %v3072_v13 = vld [vmem:[%s4297_s5] sm:$0xff]   ;;  %2509 = vmatprep.subr.bf16.mxu0 %v3071_v30  ;;  %v3077_v33 = vld [vmem:[%s4297_s5 + $0x58] sm:$0xff]  }
 0x2a4   :  { %v2920_v1 = vunpack.i.h.bf16 %v2918_v16  ;;  %v2919_v37 = vunpack.i.l.bf16 %v2918_v16  ;;  %1798 = vmatprep.subr.bf16.mxu1 %v3053_v18  ;;  %2510 = vmatpush3.bf16.msra.mxu0 %v3072_v13  ;;  %v3078_v40 = vld [vmem:[%s4297_s5 + $0x18] sm:$0xff]  }
 0x2a6   :  { %v4092_v31 = vpack.c.bf16 %v2920_v1, %v2919_v37  ;;  %v1201_v50 = vsel %vm1196_vm9, %v2914_v45, %v2919_v37  ;;  %v1202_v57 = vsel %vm1196_vm9, %v2915_v44, %v2920_v1  ;;  %v3073_v1 = vld [vmem:[%s4297_s5 + $0x48] sm:$0xff]   ;;  %v3084_v44 = vld [vmem:[%s4297_s5 + $0x30] sm:$0xff]  }
 0x2a7   :  { %1799 = vmatpush1.bf16.msra.mxu1 %v3051_v39  ;;  %v1218_v3 = vpack.c.bf16 %v1202_v57, %v1201_v50  ;;  %v3074_v37 = vld [vmem:[%s4297_s5 + $0x8] sm:$0xff]   ;;  %2511 = vmatprep.subr.bf16.mxu0 %v3073_v1 }
 0x2a8   :  { %1841 = vmatprep.subr.bf16.mxu1 %v3056_v20  ;;  %v3075_v20 = vld [vmem:[%s4297_s5 + $0x50] sm:$0xff]   ;;  %2512 = vmatpush3.bf16.msra.mxu0 %v3074_v37 }
 0x2a9   :  { %2513 = vmatprep.subr.bf16.mxu0 %v3075_v20 }
 0x2aa   :  { %1801 = vmatmul.mubr.bf16.vlgmr.msra.gmra.mrb[0].mxu1 %v1207_v54  ;;  %v2474_v54 = vcombine.high %v1299_v27, %v1299_v27 }
 0x2ab   :  { %1810 = vmatprep.mubr.bf16.mxu1 %v1213_v23  ;;  %1842 = vmatpush1.bf16.msra.mxu1 %v3054_v19  ;;  %v3079_v19 = vld [vmem:[%s4297_s5 + $0x60] sm:$0xff]   ;;  %v3082_v23 = vld [vmem:[%s4297_s5 + $0x28] sm:$0xff]  }
 0x2ac   :  { %1843 = vmatprep.subr.bf16.mxu1 %v3059_v26  ;;  %v3080_v26 = vld [vmem:[%s4297_s5 + $0x20] sm:$0xff]  }
 0x2af   :  { %1844 = vmatpush1.bf16.msra.mxu1 %v3057_v5  ;;  %v3083_v5 = vld [vmem:[%s4297_s5 + $0x70] sm:$0xff]  }
 0x2b0   :  { %1845 = vmatprep.subr.bf16.mxu1 %v3062_v9 }
 0x2b2   :  { %1811 = vmatmul.mubr.bf16.gmra.mrb[4].mxu1 %v1212_v41 }
 0x2b3   :  { %1820 = vmatprep.mubr.bf16.mxu1 %v1218_v3  ;;  %1846 = vmatpush1.bf16.msra.mxu1 %v3060_v62  ;;  %v2480_v3 = vld [vmem:[%s4298_s4] ss:$0 sm:$0xff]  ;;  %s3105_s4 = smov 80  }
 0x2b4   :  { %1847 = vmatprep.subr.bf16.mxu1 %v3065_v42 }
 0x2b7   :  { %1848 = vmatpush1.bf16.msra.mxu1 %v3063_v14 }
 0x2b8   :  { %1849 = vmatprep.subr.bf16.mxu1 %v3068_v59 }
 0x2ba   :  { %1821 = vmatmul.mubr.bf16.gmra.mrb[8].mxu1 %v1217_v22 }
 0x2bb   :  { %1850 = vmatpush1.bf16.msra.mxu1 %v3066_v11 }
 0x2bc   :  { %2475 = vmatprep.subr.msk.bf16.mxu1 %vm1688_vm10, %v2474_v54 }
 0x2bf   :  { %1852 = vmatpush1.bf16.msra.mxu1 %v1690_v53 }
 0x2e9   :  { %v2923_v21 = vpop.permute.xlu0 %2922 }
 0x2ea   :  { %v2925_v38 = vunpack.i.h.bf16 %v2923_v21  ;;  %v2924_v35 = vunpack.i.l.bf16 %v2923_v21 }
 0x2ec   :  { %v1194_v52 = vsel %vm1187_vm8, %v2889_v49, %v2924_v35  ;;  %v1195_v56 = vsel %vm1187_vm8, %v2890_v10, %v2925_v38 }
 0x2ed   :  { %v1222_v48 = vpack.c.bf16 %v1195_v56, %v1194_v52 }
 0x2f1   :  { %v2928_v6 = vpop.permute.xlu1 %2927 }
 0x2f2   :  { %v2930_v28 = vunpack.i.h.bf16 %v2928_v6  ;;  %v2929_v32 = vunpack.i.l.bf16 %v2928_v6 }
 0x2f4   :  { %v1203_v46 = vsel %vm1196_vm9, %v2924_v35, %v2929_v32  ;;  %v1204_v0 = vsel %vm1196_vm9, %v2925_v38, %v2930_v28  ;;  %v1224_v58 = vpack.c.bf16 %v2930_v28, %v2929_v32 }
 0x2f5   :  { %v1223_v8 = vpack.c.bf16 %v1204_v0, %v1203_v46 }
 0x2f7   :  { %1830 = vmatprep.mubr.bf16.mxu1 %v1223_v8 }
 0x2f8   :  { %1831 = vmatmul.mubr.bf16.gmra.mrb[12].mxu1 %v1222_v48  ;;  %v3106_v48 = vmov 0.0  }
 0x2f9   :  { %1873 = vmatprep.mubr.bf16.mxu1 %v3103_v55 }
 0x300   :  { %2476 = vmatmul.mubr.msk.bf16.vlgmr.msra.gmra.mrb[0].mxu1 %vm1675_vm11, %v4074_v7 }
 0x301   :  { %1883 = vmatprep.mubr.bf16.mxu1 %v3103_v55 }
 0x308   :  { %2477 = vmatmul.mubr.msk.bf16.gmra.mrb[4].mxu1 %vm1675_vm11, %v4084_v4 }
 0x309   :  { %1893 = vmatprep.mubr.bf16.mxu1 %v3103_v55 }
 0x310   :  { %2478 = vmatmul.mubr.msk.bf16.gmra.mrb[8].mxu1 %vm1675_vm11, %v4092_v31  ;;  %v3076_v31 = vld [vmem:[%s4297_s5 + $0x10] sm:$0xff]  }
 0x311   :  { %1903 = vmatprep.mubr.bf16.mxu1 %v3103_v55  ;;  %2514 = vmatpush3.bf16.msra.mxu0 %v3076_v31 }
 0x312   :  { %2515 = vmatprep.subr.bf16.mxu0 %v3077_v33  ;;  %v3087_v33 = vld [vmem:[%s4297_s5 + $0x80] sm:$0xff]  }
 0x315   :  { %2516 = vmatpush3.bf16.msra.mxu0 %v3078_v40  ;;  %v3088_v40 = vld [vmem:[%s4297_s5 + $0x88] sm:$0xff]  }
 0x316   :  { %2517 = vmatprep.subr.bf16.mxu0 %v3079_v19  ;;  %v3089_v19 = vld [vmem:[%s4297_s5 + $0x90] sm:$0xff]  }
 0x318   :  { %2479 = vmatmul.mubr.msk.bf16.gmra.mrb[12].mxu1 %vm1675_vm11, %v1224_v58 }
 0x319   :  { %2518 = vmatpush3.bf16.msra.mxu0 %v3080_v26  ;;  %v3090_v26 = vld [vmem:[%s4297_s5 + $0x98] sm:$0xff]  }
 0x31a   :  { %2519 = vmatprep.subr.bf16.mxu0 %v3081_v61 }
 0x31d   :  { %2520 = vmatpush3.bf16.msra.mxu0 %v3082_v23  ;;  %v3091_v23 = vld [vmem:[%s4299_s7] sm:$0xff]  }
 0x31e   :  { %2521 = vmatprep.subr.bf16.mxu0 %v3083_v5  ;;  %v3092_v5 = vld [vmem:[%s4299_s7 + $0x8] sm:$0xff]  }
 0x321   :  { %2522 = vmatpush3.bf16.msra.mxu0 %v3084_v44  ;;  %v3093_v44 = vld [vmem:[%s4299_s7 + $0x10] sm:$0xff]  }
 0x322   :  { %2523 = vmatprep.subr.bf16.mxu0 %v3085_v60 }
 0x325   :  { %2524 = vmatpush3.bf16.msra.mxu0 %v3086_v29 }
 0x326   :  { %2541 = vmatprep.subr.bf16.mxu0 %v3106_v48 }
 0x3d3   :  { %v4151_v10 = vpop.f32.mrb[0].mxu1 }
 0x3d4   :  { %v1877_v49 = vpop.f32.mrb[1].mxu1 }
 0x3d5   :  { %v4153_v24 = vpop.f32.mrb[2].mxu1 }
 0x3d6   :  { %v1881_v25 = vpop.f32.mrb[3].mxu1 }
 0x3db   :  { %v4155_v34 = vpop.f32.mrb[4].mxu1 }
 0x3dc   :  { %1938 = vrot.lane.b32.xlu0 %v4155_v34, %s3104_s3  ;;  %v1887_v7 = vpop.f32.mrb[5].mxu1 }
 0x3dd   :  { %1940 = vrot.lane.b32.xlu1 %v1887_v7, %s3104_s3  ;;  %v4160_v36 = vpop.f32.mrb[6].mxu1 }
 0x3de   :  { %v1891_v2 = vpop.f32.mrb[7].mxu1 }
 0x3e0   :  { %1942 = vrot.lane.b32.xlu0 %v4160_v36, %s3104_s3 }
 0x3e1   :  { %1944 = vrot.lane.b32.xlu1 %v1891_v2, %s3104_s3 }
 0x3e3   :  { %v4165_v47 = vpop.f32.mrb[8].mxu1 }
 0x3e4   :  { %1946 = vrot.lane.b32.xlu0 %v4165_v47, %s3104_s3  ;;  %v1897_v51 = vpop.f32.mrb[9].mxu1 }
 0x3e5   :  { %1948 = vrot.lane.b32.xlu1 %v1897_v51, %s3104_s3  ;;  %v4170_v15 = vpop.f32.mrb[10].mxu1 }
 0x3e6   :  { %v1901_v18 = vpop.f32.mrb[11].mxu1 }
 0x3e8   :  { %1950 = vrot.lane.b32.xlu0 %v4170_v15, %s3104_s3 }
 0x3e9   :  { %1952 = vrot.lane.b32.xlu1 %v1901_v18, %s3104_s3 }
 0x3eb   :  { %v4175_v17 = vpop.f32.mrb[12].mxu1 }
 0x3ec   :  { %1954 = vrot.lane.b32.xlu0 %v4175_v17, %s3104_s3  ;;  %v1907_v4 = vpop.f32.mrb[13].mxu1 }
 0x3ed   :  { %1956 = vrot.lane.b32.xlu1 %v1907_v4, %s3104_s3  ;;  %v4180_v16 = vpop.f32.mrb[14].mxu1 }
 0x3ee   :  { %v1911_v39 = vpop.f32.mrb[15].mxu1 }
 0x3f0   :  { %1958 = vrot.lane.b32.xlu0 %v4180_v16, %s3104_s3 }
 0x3f1   :  { %1960 = vrot.lane.b32.xlu1 %v1911_v39, %s3104_s3 }
 0x3f4   :  { %1930 = vrot.lane.b32.xlu0 %v4151_v10, %s3104_s3 }
 0x3f5   :  { %1932 = vrot.lane.b32.xlu1 %v1877_v49, %s3104_s3 }
 0x3f8   :  { %1934 = vrot.lane.b32.xlu0 %v4153_v24, %s3104_s3 }
 0x3f9   :  { %1936 = vrot.lane.b32.xlu1 %v1881_v25, %s3104_s3 }
 0x44e   :  { %v1939_v45 = vpop.permute.xlu0 %1938 }
 0x44f   :  { %v1941_v9 = vpop.permute.xlu1 %1940 }
 0x450   :  { %v1965_v43 = vsel %vm1962_vm12, %v1939_v45, %v1941_v9  ;;  %v3094_v45 = vld [vmem:[%s4299_s7 + $0x18] ss:$0 sps:$4 sm:$0x11]  }
 0x451   :  { %v1981_v41 = vmax.f32 %v4155_v34, %v1965_v43  ;;  %v2320_v9 = vsel %vm2318_vm1, %v3094_v45, 0 }
 0x452   :  { %v1943_v50 = vpop.permute.xlu0 %1942 }
 0x453   :  { %v1945_v57 = vpop.permute.xlu1 %1944 }
 0x454   :  { %v1966_v62 = vsel %vm1962_vm12, %v1943_v50, %v1945_v57 }
 0x455   :  { %v1982_v42 = vmax.f32 %v4160_v36, %v1966_v62 }
 0x456   :  { %v1947_v14 = vpop.permute.xlu0 %1946 }
 0x457   :  { %v1988_v59 = vmax.f32 %v1981_v41, %v1982_v42  ;;  %v1949_v63 = vpop.permute.xlu1 %1948  ;;  %v2481_v41 = vld [vmem:[%s4300_s6] ss:$0 sm:$0xff] }
 0x458   :  { %v1967_v11 = vsel %vm1962_vm12, %v1947_v14, %v1949_v63 }
 0x459   :  { %v1999_v27 = vadd.f32 %v2480_v3, %v1988_v59  ;;  %v1983_v21 = vmax.f32 %v4165_v47, %v1967_v11 }
 0x45a   :  { %v1951_v22 = vpop.permute.xlu0 %1950 }
 0x45b   :  { %v2003_v54 = vmax.f32 %v1999_v27, 0.0  ;;  %v1953_v12 = vpop.permute.xlu1 %1952 }
 0x45c   :  { %v1968_v53 = vsel %vm1962_vm12, %v1951_v22, %v1953_v12  ;;  %v2503_v22 = vld [vmem:[%s4301_s8] ss:$0 sm:$0xff] }
 0x45d   :  { %v1984_v38 = vmax.f32 %v4170_v15, %v1968_v53  ;;  %2007 = vrot.lane.b32.xlu0 %v2003_v54, %s3105_s4 }
 0x45e   :  { %v1955_v35 = vpop.permute.xlu0 %1954 }
 0x45f   :  { %v1989_v6 = vmax.f32 %v1983_v21, %v1984_v38  ;;  %v1957_v28 = vpop.permute.xlu1 %1956 }
 0x460   :  { %v1969_v52 = vsel %vm1962_vm12, %v1955_v35, %v1957_v28 }
 0x461   :  { %v2000_v32 = vadd.f32 %v2480_v3, %v1989_v6  ;;  %v1985_v55 = vmax.f32 %v4175_v17, %v1969_v52 }
 0x462   :  { %v1959_v56 = vpop.permute.xlu0 %1958 }
 0x463   :  { %v2004_v46 = vmax.f32 %v2000_v32, 0.0  ;;  %v1961_v0 = vpop.permute.xlu1 %1960 }
 0x464   :  { %v1970_v8 = vsel %vm1962_vm12, %v1959_v56, %v1961_v0 }
 0x465   :  { %v1986_v58 = vmax.f32 %v4180_v16, %v1970_v8  ;;  %2011 = vrot.lane.b32.xlu1 %v2004_v46, %s3107_s23 }
 0x466   :  { %v1931_v49 = vpop.permute.xlu0 %1930 }
 0x467   :  { %v1990_v25 = vmax.f32 %v1985_v55, %v1986_v58  ;;  %v1933_v34 = vpop.permute.xlu1 %1932 }
 0x468   :  { %v1963_v7 = vsel %vm1962_vm12, %v1931_v49, %v1933_v34 }
 0x469   :  { %v2001_v36 = vadd.f32 %v2480_v3, %v1990_v25  ;;  %v1979_v2 = vmax.f32 %v4151_v10, %v1963_v7 }
 0x46a   :  { %v1935_v47 = vpop.permute.xlu0 %1934 }
 0x46b   :  { %v2005_v51 = vmax.f32 %v2001_v36, 0.0  ;;  %v1937_v15 = vpop.permute.xlu1 %1936 }
 0x46c   :  { %v1964_v18 = vsel %vm1962_vm12, %v1935_v47, %v1937_v15 }
 0x46d   :  { %v1980_v4 = vmax.f32 %v4153_v24, %v1964_v18  ;;  %2015 = vrot.lane.b32.xlu0 %v2005_v51, %s3098_s26 }
 0x46f   :  { %v1987_v17 = vmax.f32 %v1979_v2, %v1980_v4 }
 0x471   :  { %v1998_v16 = vadd.f32 %v2480_v3, %v1987_v17 }
 0x473   :  { %v2002_v13 = vmax.f32 %v1998_v16, 0.0 }
 0x4cf   :  { %v2008_v39 = vpop.permute.xlu0 %2007 }
 0x4d0   :  { %v2019_v1 = vsel %vm2018_vm13, %v2002_v13, %v2008_v39 }
 0x4d1   :  { %v2023_v24 = vpack.c.bf16 %v2019_v1, %v2019_v1 }
 0x4d7   :  { %v2012_v30 = vpop.permute.xlu1 %2011 }
 0x4d8   :  { %v2021_v37 = vsel %vm2020_vm14, %v2008_v39, %v2012_v30 }
 0x4df   :  { %v2016_v20 = vpop.permute.xlu0 %2015 }
 0x4e0   :  { %v2022_v10 = vsel %vm451_vm4, %v2021_v37, %v2016_v20  ;;  %v2025_v61 = vpack.c.bf16 %v2016_v20, %v2016_v20 }
 0x4e1   :  { %v2024_v31 = vpack.c.bf16 %v2022_v10, %v2022_v10 }
 0x4e3   :  { %2229 = vmatprep.mubr.bf16.mxu0 %v2024_v31 }
 0x4e4   :  { %2230 = vmatmul.mubr.bf16.vlgmr.msra.gmra.mrb[48].mxu0 %v2023_v24 }
 0x4e5   :  { %2542 = vmatpush3.bf16.msra.mxu0 %v3087_v33  ;;  %2549 = vmatprep.mubr.msk.bf16.mxu0 %vm3108_vm15, %v3106_v48 }
 0x4e6   :  { %2543 = vmatprep.subr.bf16.mxu0 %v3106_v48 }
 0x4e9   :  { %2544 = vmatpush3.bf16.msra.mxu0 %v3088_v40 }
 0x4ea   :  { %2545 = vmatprep.subr.bf16.mxu0 %v3106_v48 }
 0x4ed   :  { %2546 = vmatpush3.bf16.msra.mxu0 %v3089_v19 }
 0x4ee   :  { %2547 = vmatprep.subr.bf16.mxu0 %v3106_v48 }
 0x4f1   :  { %2548 = vmatpush3.bf16.msra.mxu0 %v3090_v26 }
 0x4f2   :  { %2553 = vmatprep.subr.bf16.mxu0 %v3106_v48 }
 0x4f4   :  { %2550 = vmatmul.mubr.msk.bf16.vlgmr.msra.gmra.mrb[52].mxu0 %vm2193_vm0, %v2025_v61 }
 0x4f5   :  { %2561 = vmatprep.mubr.msk.bf16.mxu0 %vm3108_vm15, %v3106_v48  ;;  %2554 = vmatpush3.bf16.msra.mxu0 %v3091_v23 }
 0x4f6   :  { %2555 = vmatprep.subr.bf16.mxu0 %v3106_v48 }
 0x4f9   :  { %2556 = vmatpush3.bf16.msra.mxu0 %v3092_v5 }
 0x4fa   :  { %2557 = vmatprep.subr.bf16.mxu0 %v3106_v48 }
 0x4fd   :  { %2558 = vmatpush3.bf16.msra.mxu0 %v3093_v44 }
 0x4fe   :  { %2559 = vmatprep.subr.bf16.mxu0 %v3106_v48 }
 0x501   :  { %2560 = vmatpush3.bf16.msra.mxu0 %v2320_v9 }
 0x5b7   :  { %v2525_v60 = vpop.f32.mrb[48].mxu0 }
 0x5b8   :  { %v2526_v43 = vpop.f32.mrb[49].mxu0 }
 0x5b9   :  { %v2527_v50 = vadd.f32 %v2526_v43, %v2525_v60  ;;  %v2528_v57 = vpop.f32.mrb[50].mxu0 }
 0x5ba   :  { %v2529_v62 = vpop.f32.mrb[51].mxu0 }
 0x5bb   :  { %v2232_v42 = vadd.f32 %v2527_v50, %v2481_v41 }
 0x5c7   :  { %v2271_v3 = vpop.f32.mrb[52].mxu0 }
 0x5c8   :  { %v2272_v14 = vadd.f32 %v2271_v3, %v2232_v42  ;;  %v2551_v59 = vpop.f32.mrb[53].mxu0 }
 0x5c9   :  { %v2274_v63 = vpop.f32.mrb[54].mxu0 }
 0x5ca   :  { %v2277_v29 = vmax.f32 %v2272_v14, 0.0  ;;  %v2552_v27 = vpop.f32.mrb[55].mxu0 }
 0x5cc   :  { %v2278_v11 = vpack.c.bf16 %v2277_v29, %v2277_v29 }
 0x5ce   :  { %2562 = vmatmul.mubr.msk.bf16.vlgmr.msra.gmra.mrb[56].mxu0 %vm2314_vm2, %v2278_v11 }
 0x6a1   :  { %v2356_v54 = vpop.f32.mrb[56].mxu0 }
 0x6a2   :  { %v2357_v12 = vadd.f32 %v2503_v22, %v2356_v54  ;;  %v2563_v53 = vpop.f32.mrb[57].mxu0 }
 0x6a3   :  { %v2359_v21 = vpop.f32.mrb[58].mxu0 }
 0x6a4   :  { %2362 = vst [vmem:[%s4302_s9] sm:$0xff] %v2357_v12  ;;  %v2564_v38 = vpop.f32.mrb[59].mxu0 }

</bundles_post_ra>
